<compile_context>
chip_gen: v7x
topology: tpu7x:2x2x1
jax: 0.10.0
libtpu: 0.0.40
codegen_flags: <defaults>
</compile_context>

<pallas_src>
import functools

import jax
import jax.numpy as jnp
from jax.experimental import pallas as pl
from jax.experimental.pallas import tpu as pltpu


# ----------------------------------------------------------------------------
# Fused Pallas kernel (all LSTM layers + fc)
# ----------------------------------------------------------------------------
def _vmem_spec():
    return pl.BlockSpec(memory_space=pltpu.MemorySpace.VMEM)


def _make_fused_lstm_kernel(num_layers, seq_len, hidden_size):
    T, H = seq_len, hidden_size

    def kernel(*refs):
        # refs: x_flat, (w_ih, w_hh, b) * num_layers, w_fc, b_fc, out
        x_ref = refs[0]                               # (T*B, D_in)
        layer_refs = refs[1:1 + 3 * num_layers]
        w_fc_ref = refs[1 + 3 * num_layers]           # (1, H)
        b_fc_ref = refs[2 + 3 * num_layers]           # (1, 1)
        out_ref = refs[3 + 3 * num_layers]            # (B, 1)

        B = out_ref.shape[0]

        x_all = x_ref[...]                            # (T*B, D_in), lives in vregs
        h_last = None
        for layer in range(num_layers):
            w_ih_ref, w_hh_ref, b_ref = layer_refs[3 * layer:3 * layer + 3]
            is_last = (layer == num_layers - 1)

            # ---- hoisted input projection: all timesteps in one MXU matmul ----
            xg = (
                jnp.dot(x_all, w_ih_ref[...], preferred_element_type=jnp.float32)
                + b_ref[...]                           # (T*B, 4H), bias added once
            )
            w_hh = w_hh_ref[...]                       # loop-invariant, (H, 4H)

            # ---- serial recurrence: only h @ W_hh on the critical path ----
            h = jnp.zeros((B, H), jnp.float32)
            c = jnp.zeros((B, H), jnp.float32)
            hs = []
            for t in range(T):                         # static, fully unrolled
                gates = xg[t * B:(t + 1) * B, :] + jnp.dot(
                    h, w_hh, preferred_element_type=jnp.float32)   # (B, 4H) = 1 vreg
                sig = jax.nn.sigmoid(gates)            # one EUP pass over the slab
                i_g = sig[:, 0 * H:1 * H]
                f_g = sig[:, 1 * H:2 * H]
                o_g = sig[:, 3 * H:4 * H]
                g_g = jnp.tanh(gates[:, 2 * H:3 * H])
                c = f_g * c + i_g * g_g
                h = o_g * jnp.tanh(c)
                if not is_last:
                    hs.append(h)

            if not is_last:
                # Next layer's (hoisted) input: sublane-aligned concat, stays in vregs.
                x_all = jnp.concatenate(hs, axis=0)    # (T*B, H)
            h_last = h

        # ---- fc epilogue: VPU multiply + lane reduction (no N=1 MXU matmul) ----
        out = (jnp.sum(h_last * w_fc_ref[...], axis=-1, keepdims=True)
               + b_fc_ref[...])
        out_ref[...] = out.astype(out_ref.dtype)

    return kernel


# ----------------------------------------------------------------------------
# Wrapper
# ----------------------------------------------------------------------------
@functools.partial(jax.jit, static_argnames=("num_layers",))
def lstm_model_forward(x, params, num_layers):
    """Equivalent of LSTM.forward: x (B, T, D_in) -> (B, 1)."""
    B, T, D_in = x.shape
    H = params["fc"][0].shape[1]

    # layout: (B, T, D) -> (T, B, D) -> (T*B, D); pad batch up to a full
    # 8-sublane tile so every (B, 4H) gate slab is one full vreg.  Padded rows
    # are discarded on the way out.
    B_pad = max(8, ((B + 7) // 8) * 8)
    x_tbd = jnp.transpose(x, (1, 0, 2)).astype(jnp.float32)
    if B_pad != B:
        x_tbd = jnp.pad(x_tbd, ((0, 0), (0, B_pad - B), (0, 0)))
    x_flat = x_tbd.reshape(T * B_pad, D_in)

    flat_inputs = [x_flat]
    for layer in range(num_layers):
        flat_inputs.extend(params[f"layer_{layer}"])
    w_fc, b_fc = params["fc"]
    flat_inputs.extend([w_fc, b_fc])

    kernel = _make_fused_lstm_kernel(num_layers, T, H)
    out_pad = pl.pallas_call(
        kernel,
        out_shape=jax.ShapeDtypeStruct((B_pad, 1), jnp.float32),
        in_specs=[_vmem_spec()] * len(flat_inputs),
        out_specs=_vmem_spec(),
    )(*flat_inputs)
    return out_pad[:B]


def init_params(key, input_size, hidden_size, num_layers):
    """Deterministic init mimicking torch.nn.LSTM / nn.Linear uniform init."""
    params = {}
    bound = 1.0 / jnp.sqrt(hidden_size)
    for layer in range(num_layers):
        d_in = input_size if layer == 0 else hidden_size
        key, k1, k2, k3, k4 = jax.random.split(key, 5)
        # Stored transposed vs PyTorch: (in, 4H) so kernel does x @ W.
        w_ih = jax.random.uniform(k1, (d_in, 4 * hidden_size),
                                  minval=-bound, maxval=bound, dtype=jnp.float32)
        w_hh = jax.random.uniform(k2, (hidden_size, 4 * hidden_size),
                                  minval=-bound, maxval=bound, dtype=jnp.float32)
        b_ih = jax.random.uniform(k3, (4 * hidden_size,),
                                  minval=-bound, maxval=bound, dtype=jnp.float32)
        b_hh = jax.random.uniform(k4, (4 * hidden_size,),
                                  minval=-bound, maxval=bound, dtype=jnp.float32)
        params[f"layer_{layer}"] = (w_ih, w_hh, (b_ih + b_hh)[None, :])

    key, k1, k2 = jax.random.split(key, 3)
    fc_bound = 1.0 / jnp.sqrt(hidden_size)
    # nn.Linear(hidden, 1): weight (1, H), bias (1,) -> stored (1, H) / (1, 1).
    w_fc = jax.random.uniform(k1, (1, hidden_size),
                              minval=-fc_bound, maxval=fc_bound, dtype=jnp.float32)
    b_fc = jax.random.uniform(k2, (1, 1),
                              minval=-fc_bound, maxval=fc_bound, dtype=jnp.float32)
    params["fc"] = (w_fc, b_fc)
    return params


if __name__ == "__main__":
    # Small shapes consistent with the module: batch=2, seq=8, input_size=4,
    # hidden_size=32, num_stacked_layers=2.
    batch, seq, input_size = 2, 8, 4
    hidden_size, num_layers = 32, 2

    key = jax.random.PRNGKey(0)
    key, xk = jax.random.split(key)
    x = jax.random.normal(xk, (batch, seq, input_size), dtype=jnp.float32)

    params = init_params(key, input_size, hidden_size, num_layers)

    out = lstm_model_forward(x, params, num_layers)
    out = jax.block_until_ready(out)
    assert out.shape == (batch, 1), out.shape
    assert out.dtype == jnp.float32
    assert bool(jnp.all(jnp.isfinite(out)))

    print("KERNEL_OK")
</pallas_src>

<mosaic_0001>
module attributes {stable_mosaic.version = 11 : i64} {
  func.func @kernel(%arg0: memref<64x4xf32, #tpu.memory_space<vmem>>, %arg1: memref<4x128xf32, #tpu.memory_space<vmem>>, %arg2: memref<32x128xf32, #tpu.memory_space<vmem>>, %arg3: memref<1x128xf32, #tpu.memory_space<vmem>>, %arg4: memref<32x128xf32, #tpu.memory_space<vmem>>, %arg5: memref<32x128xf32, #tpu.memory_space<vmem>>, %arg6: memref<1x128xf32, #tpu.memory_space<vmem>>, %arg7: memref<1x32xf32, #tpu.memory_space<vmem>>, %arg8: memref<1x1xf32, #tpu.memory_space<vmem>>, %arg9: memref<8x1xf32, #tpu.memory_space<vmem>>) attributes {dimension_semantics = [], scalar_prefetch = 0 : i64, scratch_operands = 0 : i64, tpu.core_type = #tpu.core_type<tc>} {
    %c0 = arith.constant 0 : index
    %c0_0 = arith.constant 0 : index
    %0 = vector.load %arg0[%c0, %c0_0] : memref<64x4xf32, #tpu.memory_space<vmem>>, vector<64x4xf32>
    %c0_1 = arith.constant 0 : index
    %c0_2 = arith.constant 0 : index
    %1 = vector.load %arg1[%c0_1, %c0_2] : memref<4x128xf32, #tpu.memory_space<vmem>>, vector<4x128xf32>
    %cst = arith.constant dense<0.000000e+00> : vector<64x128xf32>
    %2 = tpu.matmul %0, %1, %cst {dimension_numbers = #tpu.dot_dimension_numbers<[1], [0], [0], [1], [0, 0, 1, 1], [], []>} : vector<64x4xf32>, vector<4x128xf32>, vector<64x128xf32> -> vector<64x128xf32>
    %c0_3 = arith.constant 0 : index
    %c0_4 = arith.constant 0 : index
    %3 = vector.load %arg3[%c0_3, %c0_4] : memref<1x128xf32, #tpu.memory_space<vmem>>, vector<1x128xf32>
    %4 = vector.broadcast %3 : vector<1x128xf32> to vector<64x128xf32>
    %5 = arith.addf %2, %4 : vector<64x128xf32>
    %c0_5 = arith.constant 0 : index
    %c0_6 = arith.constant 0 : index
    %6 = vector.load %arg2[%c0_5, %c0_6] : memref<32x128xf32, #tpu.memory_space<vmem>>, vector<32x128xf32>
    %cst_7 = arith.constant 0.000000e+00 : f32
    %7 = vector.broadcast %cst_7 : f32 to vector<8x32xf32>
    %cst_8 = arith.constant 0.000000e+00 : f32
    %8 = vector.broadcast %cst_8 : f32 to vector<8x32xf32>
    %9 = vector.extract_strided_slice %5 {offsets = [0, 0], sizes = [8, 128], strides = [1, 1]} : vector<64x128xf32> to vector<8x128xf32>
    %cst_9 = arith.constant dense<0.000000e+00> : vector<8x128xf32>
    %10 = tpu.matmul %7, %6, %cst_9 {dimension_numbers = #tpu.dot_dimension_numbers<[1], [0], [0], [1], [0, 0, 1, 1], [], []>} : vector<8x32xf32>, vector<32x128xf32>, vector<8x128xf32> -> vector<8x128xf32>
    %11 = arith.addf %9, %10 : vector<8x128xf32>
    %12 = arith.negf %11 : vector<8x128xf32>
    %13 = math.exp %12 : vector<8x128xf32>
    %cst_10 = arith.constant 1.000000e+00 : f32
    %14 = vector.broadcast %cst_10 : f32 to vector<8x128xf32>
    %15 = arith.addf %14, %13 : vector<8x128xf32>
    %16 = arith.divf %14, %15 : vector<8x128xf32>
    %17 = vector.extract_strided_slice %16 {offsets = [0, 0], sizes = [8, 32], strides = [1, 1]} : vector<8x128xf32> to vector<8x32xf32>
    %18 = vector.extract_strided_slice %16 {offsets = [0, 32], sizes = [8, 32], strides = [1, 1]} : vector<8x128xf32> to vector<8x32xf32>
    %19 = vector.extract_strided_slice %16 {offsets = [0, 96], sizes = [8, 32], strides = [1, 1]} : vector<8x128xf32> to vector<8x32xf32>
    %20 = vector.extract_strided_slice %11 {offsets = [0, 64], sizes = [8, 32], strides = [1, 1]} : vector<8x128xf32> to vector<8x32xf32>
    %21 = math.tanh %20 : vector<8x32xf32>
    %22 = arith.mulf %18, %8 : vector<8x32xf32>
    %23 = arith.mulf %17, %21 : vector<8x32xf32>
    %24 = arith.addf %22, %23 : vector<8x32xf32>
    %25 = math.tanh %24 : vector<8x32xf32>
    %26 = arith.mulf %19, %25 : vector<8x32xf32>
    %27 = vector.extract_strided_slice %5 {offsets = [8, 0], sizes = [8, 128], strides = [1, 1]} : vector<64x128xf32> to vector<8x128xf32>
    %cst_11 = arith.constant dense<0.000000e+00> : vector<8x128xf32>
    %28 = tpu.matmul %26, %6, %cst_11 {dimension_numbers = #tpu.dot_dimension_numbers<[1], [0], [0], [1], [0, 0, 1, 1], [], []>} : vector<8x32xf32>, vector<32x128xf32>, vector<8x128xf32> -> vector<8x128xf32>
    %29 = arith.addf %27, %28 : vector<8x128xf32>
    %30 = arith.negf %29 : vector<8x128xf32>
    %31 = math.exp %30 : vector<8x128xf32>
    %cst_12 = arith.constant 1.000000e+00 : f32
    %32 = vector.broadcast %cst_12 : f32 to vector<8x128xf32>
    %33 = arith.addf %32, %31 : vector<8x128xf32>
    %34 = arith.divf %32, %33 : vector<8x128xf32>
    %35 = vector.extract_strided_slice %34 {offsets = [0, 0], sizes = [8, 32], strides = [1, 1]} : vector<8x128xf32> to vector<8x32xf32>
    %36 = vector.extract_strided_slice %34 {offsets = [0, 32], sizes = [8, 32], strides = [1, 1]} : vector<8x128xf32> to vector<8x32xf32>
    %37 = vector.extract_strided_slice %34 {offsets = [0, 96], sizes = [8, 32], strides = [1, 1]} : vector<8x128xf32> to vector<8x32xf32>
    %38 = vector.extract_strided_slice %29 {offsets = [0, 64], sizes = [8, 32], strides = [1, 1]} : vector<8x128xf32> to vector<8x32xf32>
    %39 = math.tanh %38 : vector<8x32xf32>
    %40 = arith.mulf %36, %24 : vector<8x32xf32>
    %41 = arith.mulf %35, %39 : vector<8x32xf32>
    %42 = arith.addf %40, %41 : vector<8x32xf32>
    %43 = math.tanh %42 : vector<8x32xf32>
    %44 = arith.mulf %37, %43 : vector<8x32xf32>
    %45 = vector.extract_strided_slice %5 {offsets = [16, 0], sizes = [8, 128], strides = [1, 1]} : vector<64x128xf32> to vector<8x128xf32>
    %cst_13 = arith.constant dense<0.000000e+00> : vector<8x128xf32>
    %46 = tpu.matmul %44, %6, %cst_13 {dimension_numbers = #tpu.dot_dimension_numbers<[1], [0], [0], [1], [0, 0, 1, 1], [], []>} : vector<8x32xf32>, vector<32x128xf32>, vector<8x128xf32> -> vector<8x128xf32>
    %47 = arith.addf %45, %46 : vector<8x128xf32>
    %48 = arith.negf %47 : vector<8x128xf32>
    %49 = math.exp %48 : vector<8x128xf32>
    %cst_14 = arith.constant 1.000000e+00 : f32
    %50 = vector.broadcast %cst_14 : f32 to vector<8x128xf32>
    %51 = arith.addf %50, %49 : vector<8x128xf32>
    %52 = arith.divf %50, %51 : vector<8x128xf32>
    %53 = vector.extract_strided_slice %52 {offsets = [0, 0], sizes = [8, 32], strides = [1, 1]} : vector<8x128xf32> to vector<8x32xf32>
    %54 = vector.extract_strided_slice %52 {offsets = [0, 32], sizes = [8, 32], strides = [1, 1]} : vector<8x128xf32> to vector<8x32xf32>
    %55 = vector.extract_strided_slice %52 {offsets = [0, 96], sizes = [8, 32], strides = [1, 1]} : vector<8x128xf32> to vector<8x32xf32>
    %56 = vector.extract_strided_slice %47 {offsets = [0, 64], sizes = [8, 32], strides = [1, 1]} : vector<8x128xf32> to vector<8x32xf32>
    %57 = math.tanh %56 : vector<8x32xf32>
    %58 = arith.mulf %54, %42 : vector<8x32xf32>
    %59 = arith.mulf %53, %57 : vector<8x32xf32>
    %60 = arith.addf %58, %59 : vector<8x32xf32>
    %61 = math.tanh %60 : vector<8x32xf32>
    %62 = arith.mulf %55, %61 : vector<8x32xf32>
    %63 = vector.extract_strided_slice %5 {offsets = [24, 0], sizes = [8, 128], strides = [1, 1]} : vector<64x128xf32> to vector<8x128xf32>
    %cst_15 = arith.constant dense<0.000000e+00> : vector<8x128xf32>
    %64 = tpu.matmul %62, %6, %cst_15 {dimension_numbers = #tpu.dot_dimension_numbers<[1], [0], [0], [1], [0, 0, 1, 1], [], []>} : vector<8x32xf32>, vector<32x128xf32>, vector<8x128xf32> -> vector<8x128xf32>
    %65 = arith.addf %63, %64 : vector<8x128xf32>
    %66 = arith.negf %65 : vector<8x128xf32>
    %67 = math.exp %66 : vector<8x128xf32>
    %cst_16 = arith.constant 1.000000e+00 : f32
    %68 = vector.broadcast %cst_16 : f32 to vector<8x128xf32>
    %69 = arith.addf %68, %67 : vector<8x128xf32>
    %70 = arith.divf %68, %69 : vector<8x128xf32>
    %71 = vector.extract_strided_slice %70 {offsets = [0, 0], sizes = [8, 32], strides = [1, 1]} : vector<8x128xf32> to vector<8x32xf32>
    %72 = vector.extract_strided_slice %70 {offsets = [0, 32], sizes = [8, 32], strides = [1, 1]} : vector<8x128xf32> to vector<8x32xf32>
    %73 = vector.extract_strided_slice %70 {offsets = [0, 96], sizes = [8, 32], strides = [1, 1]} : vector<8x128xf32> to vector<8x32xf32>
    %74 = vector.extract_strided_slice %65 {offsets = [0, 64], sizes = [8, 32], strides = [1, 1]} : vector<8x128xf32> to vector<8x32xf32>
    %75 = math.tanh %74 : vector<8x32xf32>
    %76 = arith.mulf %72, %60 : vector<8x32xf32>
    %77 = arith.mulf %71, %75 : vector<8x32xf32>
    %78 = arith.addf %76, %77 : vector<8x32xf32>
    %79 = math.tanh %78 : vector<8x32xf32>
    %80 = arith.mulf %73, %79 : vector<8x32xf32>
    %81 = vector.extract_strided_slice %5 {offsets = [32, 0], sizes = [8, 128], strides = [1, 1]} : vector<64x128xf32> to vector<8x128xf32>
    %cst_17 = arith.constant dense<0.000000e+00> : vector<8x128xf32>
    %82 = tpu.matmul %80, %6, %cst_17 {dimension_numbers = #tpu.dot_dimension_numbers<[1], [0], [0], [1], [0, 0, 1, 1], [], []>} : vector<8x32xf32>, vector<32x128xf32>, vector<8x128xf32> -> vector<8x128xf32>
    %83 = arith.addf %81, %82 : vector<8x128xf32>
    %84 = arith.negf %83 : vector<8x128xf32>
    %85 = math.exp %84 : vector<8x128xf32>
    %cst_18 = arith.constant 1.000000e+00 : f32
    %86 = vector.broadcast %cst_18 : f32 to vector<8x128xf32>
    %87 = arith.addf %86, %85 : vector<8x128xf32>
    %88 = arith.divf %86, %87 : vector<8x128xf32>
    %89 = vector.extract_strided_slice %88 {offsets = [0, 0], sizes = [8, 32], strides = [1, 1]} : vector<8x128xf32> to vector<8x32xf32>
    %90 = vector.extract_strided_slice %88 {offsets = [0, 32], sizes = [8, 32], strides = [1, 1]} : vector<8x128xf32> to vector<8x32xf32>
    %91 = vector.extract_strided_slice %88 {offsets = [0, 96], sizes = [8, 32], strides = [1, 1]} : vector<8x128xf32> to vector<8x32xf32>
    %92 = vector.extract_strided_slice %83 {offsets = [0, 64], sizes = [8, 32], strides = [1, 1]} : vector<8x128xf32> to vector<8x32xf32>
    %93 = math.tanh %92 : vector<8x32xf32>
    %94 = arith.mulf %90, %78 : vector<8x32xf32>
    %95 = arith.mulf %89, %93 : vector<8x32xf32>
    %96 = arith.addf %94, %95 : vector<8x32xf32>
    %97 = math.tanh %96 : vector<8x32xf32>
    %98 = arith.mulf %91, %97 : vector<8x32xf32>
    %99 = vector.extract_strided_slice %5 {offsets = [40, 0], sizes = [8, 128], strides = [1, 1]} : vector<64x128xf32> to vector<8x128xf32>
    %cst_19 = arith.constant dense<0.000000e+00> : vector<8x128xf32>
    %100 = tpu.matmul %98, %6, %cst_19 {dimension_numbers = #tpu.dot_dimension_numbers<[1], [0], [0], [1], [0, 0, 1, 1], [], []>} : vector<8x32xf32>, vector<32x128xf32>, vector<8x128xf32> -> vector<8x128xf32>
    %101 = arith.addf %99, %100 : vector<8x128xf32>
    %102 = arith.negf %101 : vector<8x128xf32>
    %103 = math.exp %102 : vector<8x128xf32>
    %cst_20 = arith.constant 1.000000e+00 : f32
    %104 = vector.broadcast %cst_20 : f32 to vector<8x128xf32>
    %105 = arith.addf %104, %103 : vector<8x128xf32>
    %106 = arith.divf %104, %105 : vector<8x128xf32>
    %107 = vector.extract_strided_slice %106 {offsets = [0, 0], sizes = [8, 32], strides = [1, 1]} : vector<8x128xf32> to vector<8x32xf32>
    %108 = vector.extract_strided_slice %106 {offsets = [0, 32], sizes = [8, 32], strides = [1, 1]} : vector<8x128xf32> to vector<8x32xf32>
    %109 = vector.extract_strided_slice %106 {offsets = [0, 96], sizes = [8, 32], strides = [1, 1]} : vector<8x128xf32> to vector<8x32xf32>
    %110 = vector.extract_strided_slice %101 {offsets = [0, 64], sizes = [8, 32], strides = [1, 1]} : vector<8x128xf32> to vector<8x32xf32>
    %111 = math.tanh %110 : vector<8x32xf32>
    %112 = arith.mulf %108, %96 : vector<8x32xf32>
    %113 = arith.mulf %107, %111 : vector<8x32xf32>
    %114 = arith.addf %112, %113 : vector<8x32xf32>
    %115 = math.tanh %114 : vector<8x32xf32>
    %116 = arith.mulf %109, %115 : vector<8x32xf32>
    %117 = vector.extract_strided_slice %5 {offsets = [48, 0], sizes = [8, 128], strides = [1, 1]} : vector<64x128xf32> to vector<8x128xf32>
    %cst_21 = arith.constant dense<0.000000e+00> : vector<8x128xf32>
    %118 = tpu.matmul %116, %6, %cst_21 {dimension_numbers = #tpu.dot_dimension_numbers<[1], [0], [0], [1], [0, 0, 1, 1], [], []>} : vector<8x32xf32>, vector<32x128xf32>, vector<8x128xf32> -> vector<8x128xf32>
    %119 = arith.addf %117, %118 : vector<8x128xf32>
    %120 = arith.negf %119 : vector<8x128xf32>
    %121 = math.exp %120 : vector<8x128xf32>
    %cst_22 = arith.constant 1.000000e+00 : f32
    %122 = vector.broadcast %cst_22 : f32 to vector<8x128xf32>
    %123 = arith.addf %122, %121 : vector<8x128xf32>
    %124 = arith.divf %122, %123 : vector<8x128xf32>
    %125 = vector.extract_strided_slice %124 {offsets = [0, 0], sizes = [8, 32], strides = [1, 1]} : vector<8x128xf32> to vector<8x32xf32>
    %126 = vector.extract_strided_slice %124 {offsets = [0, 32], sizes = [8, 32], strides = [1, 1]} : vector<8x128xf32> to vector<8x32xf32>
    %127 = vector.extract_strided_slice %124 {offsets = [0, 96], sizes = [8, 32], strides = [1, 1]} : vector<8x128xf32> to vector<8x32xf32>
    %128 = vector.extract_strided_slice %119 {offsets = [0, 64], sizes = [8, 32], strides = [1, 1]} : vector<8x128xf32> to vector<8x32xf32>
    %129 = math.tanh %128 : vector<8x32xf32>
    %130 = arith.mulf %126, %114 : vector<8x32xf32>
    %131 = arith.mulf %125, %129 : vector<8x32xf32>
    %132 = arith.addf %130, %131 : vector<8x32xf32>
    %133 = math.tanh %132 : vector<8x32xf32>
    %134 = arith.mulf %127, %133 : vector<8x32xf32>
    %135 = vector.extract_strided_slice %5 {offsets = [56, 0], sizes = [8, 128], strides = [1, 1]} : vector<64x128xf32> to vector<8x128xf32>
    %cst_23 = arith.constant dense<0.000000e+00> : vector<8x128xf32>
    %136 = tpu.matmul %134, %6, %cst_23 {dimension_numbers = #tpu.dot_dimension_numbers<[1], [0], [0], [1], [0, 0, 1, 1], [], []>} : vector<8x32xf32>, vector<32x128xf32>, vector<8x128xf32> -> vector<8x128xf32>
    %137 = arith.addf %135, %136 : vector<8x128xf32>
    %138 = arith.negf %137 : vector<8x128xf32>
    %139 = math.exp %138 : vector<8x128xf32>
    %cst_24 = arith.constant 1.000000e+00 : f32
    %140 = vector.broadcast %cst_24 : f32 to vector<8x128xf32>
    %141 = arith.addf %140, %139 : vector<8x128xf32>
    %142 = arith.divf %140, %141 : vector<8x128xf32>
    %143 = vector.extract_strided_slice %142 {offsets = [0, 0], sizes = [8, 32], strides = [1, 1]} : vector<8x128xf32> to vector<8x32xf32>
    %144 = vector.extract_strided_slice %142 {offsets = [0, 32], sizes = [8, 32], strides = [1, 1]} : vector<8x128xf32> to vector<8x32xf32>
    %145 = vector.extract_strided_slice %142 {offsets = [0, 96], sizes = [8, 32], strides = [1, 1]} : vector<8x128xf32> to vector<8x32xf32>
    %146 = vector.extract_strided_slice %137 {offsets = [0, 64], sizes = [8, 32], strides = [1, 1]} : vector<8x128xf32> to vector<8x32xf32>
    %147 = math.tanh %146 : vector<8x32xf32>
    %148 = arith.mulf %144, %132 : vector<8x32xf32>
    %149 = arith.mulf %143, %147 : vector<8x32xf32>
    %150 = arith.addf %148, %149 : vector<8x32xf32>
    %151 = math.tanh %150 : vector<8x32xf32>
    %152 = arith.mulf %145, %151 : vector<8x32xf32>
    %153 = tpu.concatenate %26, %44, %62, %80, %98, %116, %134, %152 in 0 : vector<8x32xf32>, vector<8x32xf32>, vector<8x32xf32>, vector<8x32xf32>, vector<8x32xf32>, vector<8x32xf32>, vector<8x32xf32>, vector<8x32xf32> -> vector<64x32xf32>
    %c0_25 = arith.constant 0 : index
    %c0_26 = arith.constant 0 : index
    %154 = vector.load %arg4[%c0_25, %c0_26] : memref<32x128xf32, #tpu.memory_space<vmem>>, vector<32x128xf32>
    %cst_27 = arith.constant dense<0.000000e+00> : vector<64x128xf32>
    %155 = tpu.matmul %153, %154, %cst_27 {dimension_numbers = #tpu.dot_dimension_numbers<[1], [0], [0], [1], [0, 0, 1, 1], [], []>} : vector<64x32xf32>, vector<32x128xf32>, vector<64x128xf32> -> vector<64x128xf32>
    %c0_28 = arith.constant 0 : index
    %c0_29 = arith.constant 0 : index
    %156 = vector.load %arg6[%c0_28, %c0_29] : memref<1x128xf32, #tpu.memory_space<vmem>>, vector<1x128xf32>
    %157 = vector.broadcast %156 : vector<1x128xf32> to vector<64x128xf32>
    %158 = arith.addf %155, %157 : vector<64x128xf32>
    %c0_30 = arith.constant 0 : index
    %c0_31 = arith.constant 0 : index
    %159 = vector.load %arg5[%c0_30, %c0_31] : memref<32x128xf32, #tpu.memory_space<vmem>>, vector<32x128xf32>
    %cst_32 = arith.constant 0.000000e+00 : f32
    %160 = vector.broadcast %cst_32 : f32 to vector<8x32xf32>
    %cst_33 = arith.constant 0.000000e+00 : f32
    %161 = vector.broadcast %cst_33 : f32 to vector<8x32xf32>
    %162 = vector.extract_strided_slice %158 {offsets = [0, 0], sizes = [8, 128], strides = [1, 1]} : vector<64x128xf32> to vector<8x128xf32>
    %cst_34 = arith.constant dense<0.000000e+00> : vector<8x128xf32>
    %163 = tpu.matmul %160, %159, %cst_34 {dimension_numbers = #tpu.dot_dimension_numbers<[1], [0], [0], [1], [0, 0, 1, 1], [], []>} : vector<8x32xf32>, vector<32x128xf32>, vector<8x128xf32> -> vector<8x128xf32>
    %164 = arith.addf %162, %163 : vector<8x128xf32>
    %165 = arith.negf %164 : vector<8x128xf32>
    %166 = math.exp %165 : vector<8x128xf32>
    %cst_35 = arith.constant 1.000000e+00 : f32
    %167 = vector.broadcast %cst_35 : f32 to vector<8x128xf32>
    %168 = arith.addf %167, %166 : vector<8x128xf32>
    %169 = arith.divf %167, %168 : vector<8x128xf32>
    %170 = vector.extract_strided_slice %169 {offsets = [0, 0], sizes = [8, 32], strides = [1, 1]} : vector<8x128xf32> to vector<8x32xf32>
    %171 = vector.extract_strided_slice %169 {offsets = [0, 32], sizes = [8, 32], strides = [1, 1]} : vector<8x128xf32> to vector<8x32xf32>
    %172 = vector.extract_strided_slice %169 {offsets = [0, 96], sizes = [8, 32], strides = [1, 1]} : vector<8x128xf32> to vector<8x32xf32>
    %173 = vector.extract_strided_slice %164 {offsets = [0, 64], sizes = [8, 32], strides = [1, 1]} : vector<8x128xf32> to vector<8x32xf32>
    %174 = math.tanh %173 : vector<8x32xf32>
    %175 = arith.mulf %171, %161 : vector<8x32xf32>
    %176 = arith.mulf %170, %174 : vector<8x32xf32>
    %177 = arith.addf %175, %176 : vector<8x32xf32>
    %178 = math.tanh %177 : vector<8x32xf32>
    %179 = arith.mulf %172, %178 : vector<8x32xf32>
    %180 = vector.extract_strided_slice %158 {offsets = [8, 0], sizes = [8, 128], strides = [1, 1]} : vector<64x128xf32> to vector<8x128xf32>
    %cst_36 = arith.constant dense<0.000000e+00> : vector<8x128xf32>
    %181 = tpu.matmul %179, %159, %cst_36 {dimension_numbers = #tpu.dot_dimension_numbers<[1], [0], [0], [1], [0, 0, 1, 1], [], []>} : vector<8x32xf32>, vector<32x128xf32>, vector<8x128xf32> -> vector<8x128xf32>
    %182 = arith.addf %180, %181 : vector<8x128xf32>
    %183 = arith.negf %182 : vector<8x128xf32>
    %184 = math.exp %183 : vector<8x128xf32>
    %cst_37 = arith.constant 1.000000e+00 : f32
    %185 = vector.broadcast %cst_37 : f32 to vector<8x128xf32>
    %186 = arith.addf %185, %184 : vector<8x128xf32>
    %187 = arith.divf %185, %186 : vector<8x128xf32>
    %188 = vector.extract_strided_slice %187 {offsets = [0, 0], sizes = [8, 32], strides = [1, 1]} : vector<8x128xf32> to vector<8x32xf32>
    %189 = vector.extract_strided_slice %187 {offsets = [0, 32], sizes = [8, 32], strides = [1, 1]} : vector<8x128xf32> to vector<8x32xf32>
    %190 = vector.extract_strided_slice %187 {offsets = [0, 96], sizes = [8, 32], strides = [1, 1]} : vector<8x128xf32> to vector<8x32xf32>
    %191 = vector.extract_strided_slice %182 {offsets = [0, 64], sizes = [8, 32], strides = [1, 1]} : vector<8x128xf32> to vector<8x32xf32>
    %192 = math.tanh %191 : vector<8x32xf32>
    %193 = arith.mulf %189, %177 : vector<8x32xf32>
    %194 = arith.mulf %188, %192 : vector<8x32xf32>
    %195 = arith.addf %193, %194 : vector<8x32xf32>
    %196 = math.tanh %195 : vector<8x32xf32>
    %197 = arith.mulf %190, %196 : vector<8x32xf32>
    %198 = vector.extract_strided_slice %158 {offsets = [16, 0], sizes = [8, 128], strides = [1, 1]} : vector<64x128xf32> to vector<8x128xf32>
    %cst_38 = arith.constant dense<0.000000e+00> : vector<8x128xf32>
    %199 = tpu.matmul %197, %159, %cst_38 {dimension_numbers = #tpu.dot_dimension_numbers<[1], [0], [0], [1], [0, 0, 1, 1], [], []>} : vector<8x32xf32>, vector<32x128xf32>, vector<8x128xf32> -> vector<8x128xf32>
    %200 = arith.addf %198, %199 : vector<8x128xf32>
    %201 = arith.negf %200 : vector<8x128xf32>
    %202 = math.exp %201 : vector<8x128xf32>
    %cst_39 = arith.constant 1.000000e+00 : f32
    %203 = vector.broadcast %cst_39 : f32 to vector<8x128xf32>
    %204 = arith.addf %203, %202 : vector<8x128xf32>
    %205 = arith.divf %203, %204 : vector<8x128xf32>
    %206 = vector.extract_strided_slice %205 {offsets = [0, 0], sizes = [8, 32], strides = [1, 1]} : vector<8x128xf32> to vector<8x32xf32>
    %207 = vector.extract_strided_slice %205 {offsets = [0, 32], sizes = [8, 32], strides = [1, 1]} : vector<8x128xf32> to vector<8x32xf32>
    %208 = vector.extract_strided_slice %205 {offsets = [0, 96], sizes = [8, 32], strides = [1, 1]} : vector<8x128xf32> to vector<8x32xf32>
    %209 = vector.extract_strided_slice %200 {offsets = [0, 64], sizes = [8, 32], strides = [1, 1]} : vector<8x128xf32> to vector<8x32xf32>
    %210 = math.tanh %209 : vector<8x32xf32>
    %211 = arith.mulf %207, %195 : vector<8x32xf32>
    %212 = arith.mulf %206, %210 : vector<8x32xf32>
    %213 = arith.addf %211, %212 : vector<8x32xf32>
    %214 = math.tanh %213 : vector<8x32xf32>
    %215 = arith.mulf %208, %214 : vector<8x32xf32>
    %216 = vector.extract_strided_slice %158 {offsets = [24, 0], sizes = [8, 128], strides = [1, 1]} : vector<64x128xf32> to vector<8x128xf32>
    %cst_40 = arith.constant dense<0.000000e+00> : vector<8x128xf32>
    %217 = tpu.matmul %215, %159, %cst_40 {dimension_numbers = #tpu.dot_dimension_numbers<[1], [0], [0], [1], [0, 0, 1, 1], [], []>} : vector<8x32xf32>, vector<32x128xf32>, vector<8x128xf32> -> vector<8x128xf32>
    %218 = arith.addf %216, %217 : vector<8x128xf32>
    %219 = arith.negf %218 : vector<8x128xf32>
    %220 = math.exp %219 : vector<8x128xf32>
    %cst_41 = arith.constant 1.000000e+00 : f32
    %221 = vector.broadcast %cst_41 : f32 to vector<8x128xf32>
    %222 = arith.addf %221, %220 : vector<8x128xf32>
    %223 = arith.divf %221, %222 : vector<8x128xf32>
    %224 = vector.extract_strided_slice %223 {offsets = [0, 0], sizes = [8, 32], strides = [1, 1]} : vector<8x128xf32> to vector<8x32xf32>
    %225 = vector.extract_strided_slice %223 {offsets = [0, 32], sizes = [8, 32], strides = [1, 1]} : vector<8x128xf32> to vector<8x32xf32>
    %226 = vector.extract_strided_slice %223 {offsets = [0, 96], sizes = [8, 32], strides = [1, 1]} : vector<8x128xf32> to vector<8x32xf32>
    %227 = vector.extract_strided_slice %218 {offsets = [0, 64], sizes = [8, 32], strides = [1, 1]} : vector<8x128xf32> to vector<8x32xf32>
    %228 = math.tanh %227 : vector<8x32xf32>
    %229 = arith.mulf %225, %213 : vector<8x32xf32>
    %230 = arith.mulf %224, %228 : vector<8x32xf32>
    %231 = arith.addf %229, %230 : vector<8x32xf32>
    %232 = math.tanh %231 : vector<8x32xf32>
    %233 = arith.mulf %226, %232 : vector<8x32xf32>
    %234 = vector.extract_strided_slice %158 {offsets = [32, 0], sizes = [8, 128], strides = [1, 1]} : vector<64x128xf32> to vector<8x128xf32>
    %cst_42 = arith.constant dense<0.000000e+00> : vector<8x128xf32>
    %235 = tpu.matmul %233, %159, %cst_42 {dimension_numbers = #tpu.dot_dimension_numbers<[1], [0], [0], [1], [0, 0, 1, 1], [], []>} : vector<8x32xf32>, vector<32x128xf32>, vector<8x128xf32> -> vector<8x128xf32>
    %236 = arith.addf %234, %235 : vector<8x128xf32>
    %237 = arith.negf %236 : vector<8x128xf32>
    %238 = math.exp %237 : vector<8x128xf32>
    %cst_43 = arith.constant 1.000000e+00 : f32
    %239 = vector.broadcast %cst_43 : f32 to vector<8x128xf32>
    %240 = arith.addf %239, %238 : vector<8x128xf32>
    %241 = arith.divf %239, %240 : vector<8x128xf32>
    %242 = vector.extract_strided_slice %241 {offsets = [0, 0], sizes = [8, 32], strides = [1, 1]} : vector<8x128xf32> to vector<8x32xf32>
    %243 = vector.extract_strided_slice %241 {offsets = [0, 32], sizes = [8, 32], strides = [1, 1]} : vector<8x128xf32> to vector<8x32xf32>
    %244 = vector.extract_strided_slice %241 {offsets = [0, 96], sizes = [8, 32], strides = [1, 1]} : vector<8x128xf32> to vector<8x32xf32>
    %245 = vector.extract_strided_slice %236 {offsets = [0, 64], sizes = [8, 32], strides = [1, 1]} : vector<8x128xf32> to vector<8x32xf32>
    %246 = math.tanh %245 : vector<8x32xf32>
    %247 = arith.mulf %243, %231 : vector<8x32xf32>
    %248 = arith.mulf %242, %246 : vector<8x32xf32>
    %249 = arith.addf %247, %248 : vector<8x32xf32>
    %250 = math.tanh %249 : vector<8x32xf32>
    %251 = arith.mulf %244, %250 : vector<8x32xf32>
    %252 = vector.extract_strided_slice %158 {offsets = [40, 0], sizes = [8, 128], strides = [1, 1]} : vector<64x128xf32> to vector<8x128xf32>
    %cst_44 = arith.constant dense<0.000000e+00> : vector<8x128xf32>
    %253 = tpu.matmul %251, %159, %cst_44 {dimension_numbers = #tpu.dot_dimension_numbers<[1], [0], [0], [1], [0, 0, 1, 1], [], []>} : vector<8x32xf32>, vector<32x128xf32>, vector<8x128xf32> -> vector<8x128xf32>
    %254 = arith.addf %252, %253 : vector<8x128xf32>
    %255 = arith.negf %254 : vector<8x128xf32>
    %256 = math.exp %255 : vector<8x128xf32>
    %cst_45 = arith.constant 1.000000e+00 : f32
    %257 = vector.broadcast %cst_45 : f32 to vector<8x128xf32>
    %258 = arith.addf %257, %256 : vector<8x128xf32>
    %259 = arith.divf %257, %258 : vector<8x128xf32>
    %260 = vector.extract_strided_slice %259 {offsets = [0, 0], sizes = [8, 32], strides = [1, 1]} : vector<8x128xf32> to vector<8x32xf32>
    %261 = vector.extract_strided_slice %259 {offsets = [0, 32], sizes = [8, 32], strides = [1, 1]} : vector<8x128xf32> to vector<8x32xf32>
    %262 = vector.extract_strided_slice %259 {offsets = [0, 96], sizes = [8, 32], strides = [1, 1]} : vector<8x128xf32> to vector<8x32xf32>
    %263 = vector.extract_strided_slice %254 {offsets = [0, 64], sizes = [8, 32], strides = [1, 1]} : vector<8x128xf32> to vector<8x32xf32>
    %264 = math.tanh %263 : vector<8x32xf32>
    %265 = arith.mulf %261, %249 : vector<8x32xf32>
    %266 = arith.mulf %260, %264 : vector<8x32xf32>
    %267 = arith.addf %265, %266 : vector<8x32xf32>
    %268 = math.tanh %267 : vector<8x32xf32>
    %269 = arith.mulf %262, %268 : vector<8x32xf32>
    %270 = vector.extract_strided_slice %158 {offsets = [48, 0], sizes = [8, 128], strides = [1, 1]} : vector<64x128xf32> to vector<8x128xf32>
    %cst_46 = arith.constant dense<0.000000e+00> : vector<8x128xf32>
    %271 = tpu.matmul %269, %159, %cst_46 {dimension_numbers = #tpu.dot_dimension_numbers<[1], [0], [0], [1], [0, 0, 1, 1], [], []>} : vector<8x32xf32>, vector<32x128xf32>, vector<8x128xf32> -> vector<8x128xf32>
    %272 = arith.addf %270, %271 : vector<8x128xf32>
    %273 = arith.negf %272 : vector<8x128xf32>
    %274 = math.exp %273 : vector<8x128xf32>
    %cst_47 = arith.constant 1.000000e+00 : f32
    %275 = vector.broadcast %cst_47 : f32 to vector<8x128xf32>
    %276 = arith.addf %275, %274 : vector<8x128xf32>
    %277 = arith.divf %275, %276 : vector<8x128xf32>
    %278 = vector.extract_strided_slice %277 {offsets = [0, 0], sizes = [8, 32], strides = [1, 1]} : vector<8x128xf32> to vector<8x32xf32>
    %279 = vector.extract_strided_slice %277 {offsets = [0, 32], sizes = [8, 32], strides = [1, 1]} : vector<8x128xf32> to vector<8x32xf32>
    %280 = vector.extract_strided_slice %277 {offsets = [0, 96], sizes = [8, 32], strides = [1, 1]} : vector<8x128xf32> to vector<8x32xf32>
    %281 = vector.extract_strided_slice %272 {offsets = [0, 64], sizes = [8, 32], strides = [1, 1]} : vector<8x128xf32> to vector<8x32xf32>
    %282 = math.tanh %281 : vector<8x32xf32>
    %283 = arith.mulf %279, %267 : vector<8x32xf32>
    %284 = arith.mulf %278, %282 : vector<8x32xf32>
    %285 = arith.addf %283, %284 : vector<8x32xf32>
    %286 = math.tanh %285 : vector<8x32xf32>
    %287 = arith.mulf %280, %286 : vector<8x32xf32>
    %288 = vector.extract_strided_slice %158 {offsets = [56, 0], sizes = [8, 128], strides = [1, 1]} : vector<64x128xf32> to vector<8x128xf32>
    %cst_48 = arith.constant dense<0.000000e+00> : vector<8x128xf32>
    %289 = tpu.matmul %287, %159, %cst_48 {dimension_numbers = #tpu.dot_dimension_numbers<[1], [0], [0], [1], [0, 0, 1, 1], [], []>} : vector<8x32xf32>, vector<32x128xf32>, vector<8x128xf32> -> vector<8x128xf32>
    %290 = arith.addf %288, %289 : vector<8x128xf32>
    %291 = arith.negf %290 : vector<8x128xf32>
    %292 = math.exp %291 : vector<8x128xf32>
    %cst_49 = arith.constant 1.000000e+00 : f32
    %293 = vector.broadcast %cst_49 : f32 to vector<8x128xf32>
    %294 = arith.addf %293, %292 : vector<8x128xf32>
    %295 = arith.divf %293, %294 : vector<8x128xf32>
    %296 = vector.extract_strided_slice %295 {offsets = [0, 0], sizes = [8, 32], strides = [1, 1]} : vector<8x128xf32> to vector<8x32xf32>
    %297 = vector.extract_strided_slice %295 {offsets = [0, 32], sizes = [8, 32], strides = [1, 1]} : vector<8x128xf32> to vector<8x32xf32>
    %298 = vector.extract_strided_slice %295 {offsets = [0, 96], sizes = [8, 32], strides = [1, 1]} : vector<8x128xf32> to vector<8x32xf32>
    %299 = vector.extract_strided_slice %290 {offsets = [0, 64], sizes = [8, 32], strides = [1, 1]} : vector<8x128xf32> to vector<8x32xf32>
    %300 = math.tanh %299 : vector<8x32xf32>
    %301 = arith.mulf %297, %285 : vector<8x32xf32>
    %302 = arith.mulf %296, %300 : vector<8x32xf32>
    %303 = arith.addf %301, %302 : vector<8x32xf32>
    %304 = math.tanh %303 : vector<8x32xf32>
    %305 = arith.mulf %298, %304 : vector<8x32xf32>
    %c0_50 = arith.constant 0 : index
    %c0_51 = arith.constant 0 : index
    %306 = vector.load %arg7[%c0_50, %c0_51] : memref<1x32xf32, #tpu.memory_space<vmem>>, vector<1x32xf32>
    %307 = vector.broadcast %306 : vector<1x32xf32> to vector<8x32xf32>
    %308 = arith.mulf %305, %307 : vector<8x32xf32>
    %cst_52 = arith.constant dense<0.000000e+00> : vector<8xf32>
    %309 = vector.multi_reduction <add>, %308, %cst_52 [1] : vector<8x32xf32> to vector<8xf32>
    %310 = vector.shape_cast %309 : vector<8xf32> to vector<8x1xf32>
    %c0_53 = arith.constant 0 : index
    %c0_54 = arith.constant 0 : index
    %311 = vector.load %arg8[%c0_53, %c0_54] : memref<1x1xf32, #tpu.memory_space<vmem>>, vector<1x1xf32>
    %312 = vector.broadcast %311 : vector<1x1xf32> to vector<8x1xf32>
    %313 = arith.addf %310, %312 : vector<8x1xf32>
    %c0_55 = arith.constant 0 : index
    %c0_56 = arith.constant 0 : index
    %314 = vector.load %arg9[%c0_55, %c0_56] : memref<8x1xf32, #tpu.memory_space<vmem>>, vector<8x1xf32>
    tpu.vector_store %arg9[%c0_55, %c0_56], %313 {strides = array<i32>} : memref<8x1xf32, #tpu.memory_space<vmem>>, vector<8x1xf32>,
    return
  }
}

</mosaic_0001>

<bundles_post_ra>
// kernel: lstm_model_forward.1
= control target key start
LH: loop header
LB: loop body
LE: loop exit
PB: predicated region body
PF: predicated region fallthrough
CT: control target
= control target key end

     0   :  { %vm75_vm0 = vcmask 1043456   ;;  %vm50_vm1 = vcmask 31744   ;;  %v2538_v0 = vmov 0.0|0.0   ;;  %vm2539_vm2 = vmmov 0   ;;  %s2541_s23 = smov 64   ;;  %s2543_s30 = smov 96   ;;  %s2948_s2 = inlined_call_operand.vmem [shape: f32[32,128], index: 2, kind: input, shape index: {}]   ;;  %s2949_s1 = inlined_call_operand.vmem [shape: f32[4,128], index: 1, kind: input, shape index: {}]   ;;  %s2950_s0 = inlined_call_operand.vmem [shape: f32[64,4], index: 0, kind: input, shape index: {}]   ;;  %s2951_s3 = inlined_call_operand.vmem [shape: f32[1,128], index: 3, kind: input, shape index: {}]   ;;  %s2952_s4 = inlined_call_operand.vmem [shape: f32[32,128], index: 4, kind: input, shape index: {}]   ;;  %s2953_s5 = inlined_call_operand.vmem [shape: f32[32,128], index: 5, kind: input, shape index: {}]   ;;  %s2954_s6 = inlined_call_operand.vmem [shape: f32[1,128], index: 6, kind: input, shape index: {}]   ;;  %s2955_s7 = inlined_call_operand.vmem [shape: f32[1,32], index: 7, kind: input, shape index: {}]   ;;  %s2956_s8 = inlined_call_operand.<no memory space> [shape: f32[1,1], index: 8, kind: input, shape index: {}]   ;;  %s2957_s9 = inlined_call_operand.vmem [shape: f32[8,1], index: 9, kind: output, shape index: {}]  }
   0x1   :  { %2300 = vmatprep.subr.bf16.mxu1 %v2538_v0  ;;  %v184_v1 = vld [vmem:[%s2948_s2] sm:$0xff]  ;;  %v185_v2 = vld [vmem:[%s2948_s2 + $0x8] sm:$0xff]  ;;  %v186_v7 = vld [vmem:[%s2948_s2 + $0x10] sm:$0xff]  ;;  %v2540_v8 = vmov 0.0   ;;  %vm188_vm3 = vcmask 261120   ;;  %vm1932_vm4 = vcmask 7168  }
   0x2   :  { %v42_v3 = vld [vmem:[%s2949_s1] sm:$0xf]  ;;  %v2604_v4 = vpack.c.bf16 %v185_v2, %v184_v1  ;;  %v35_v6 = vld [vmem:[%s2950_s0 + $0x8] sm:$0xff]  ;;  %2112 = vmatprep.mubr.msk.f32.mxu1 %vm2539_vm2, %v2540_v8  ;;  %v187_v9 = vld [vmem:[%s2948_s2 + $0x18] sm:$0xff] }
   0x3   :  { %2090 = vmatprep.subr.msk.mxu0 %vm75_vm0, %v42_v3  ;;  %v34_v5 = vld [vmem:[%s2950_s0] sm:$0xff]  ;;  %v2625_v10 = vpack.c.bf16 %v187_v9, %v186_v7  ;;  %v36_v46 = vld [vmem:[%s2950_s0 + $0x10] sm:$0xff]  ;;  %v37_v47 = vld [vmem:[%s2950_s0 + $0x18] sm:$0xff] }
   0x4   :  { %2091 = vmatpush3.msk.msra.mxu0 %vm75_vm0, %v42_v3  ;;  %2092 = vmatprep.mubr.msk.f32.mxu0 %vm50_vm1, %v34_v5  ;;  %v2645_v12 = vld [vmem:[%s2951_s3] ss:$0 sm:$0xff]  ;;  %s2542_s3 = smov 32   ;;  %v39_v49 = vld [vmem:[%s2950_s0 + $0x28] sm:$0xff]  ;;  %v40_v50 = vld [vmem:[%s2950_s0 + $0x30] sm:$0xff] }
   0x5   :  { %2302 = vmatpush3.bf16.msra.mxu1 %v2604_v4  ;;  %2093 = vmatmul.mubr.msk.f32.vlgmr.msra.gmra.mrb[0].mxu0 %vm50_vm1, %v35_v6  ;;  %v38_v48 = vld [vmem:[%s2950_s0 + $0x20] sm:$0xff]  ;;  %v41_v51 = vld [vmem:[%s2950_s0 + $0x38] sm:$0xff] }
   0x6   :  { %2303 = vmatprep.subr.bf16.mxu1 %v2538_v0  ;;  %2312 = vmatprep.subr.bf16.mxu0 %v2538_v0 }
   0x7   :  { %2314 = vmatpush3.bf16.msra.mxu0 %v2604_v4  ;;  %2095 = vmatprep.mubr.msk.f32.mxu0 %vm50_vm1, %v36_v46 }
   0x8   :  { %2315 = vmatprep.subr.bf16.mxu0 %v2538_v0 }
   0x9   :  { %2305 = vmatpush3.bf16.msra.mxu1 %v2625_v10  ;;  %2096 = vmatmul.mubr.msk.f32.gmra.mrb[2].mxu0 %vm50_vm1, %v37_v47 }
   0xa   :  { %2306 = vmatprep.subr.bf16.mxu1 %v2538_v0  ;;  %2098 = vmatprep.mubr.msk.f32.mxu0 %vm50_vm1, %v38_v48 }
   0xb   :  { %2317 = vmatpush3.bf16.msra.mxu0 %v2625_v10 }
   0xc   :  { %2113 = vmatmul.mubr.f32.vlgmr.msra.gmra.mrb[0].mxu1 %v2540_v8  ;;  %2324 = vmatprep.subr.bf16.mxu0 %v2538_v0 }
   0xd   :  { %2308 = vmatpush3.bf16.msra.mxu1 %v2604_v4  ;;  %2123 = vmatprep.mubr.msk.f32.mxu1 %vm2539_vm2, %v2540_v8 }
   0xe   :  { %2309 = vmatprep.subr.bf16.mxu1 %v2538_v0  ;;  %2099 = vmatmul.mubr.msk.f32.gmra.mrb[4].mxu0 %vm50_vm1, %v39_v49 }
   0xf   :  { %2101 = vmatprep.mubr.msk.f32.mxu0 %vm50_vm1, %v40_v50 }
  0x11   :  { %2311 = vmatpush3.bf16.msra.mxu1 %v2625_v10 }
  0x12   :  { %2318 = vmatprep.subr.bf16.mxu1 %v2538_v0  ;;  %2102 = vmatmul.mubr.msk.f32.gmra.mrb[6].mxu0 %vm50_vm1, %v41_v51 }
  0x13   :  { %2134 = vmatprep.mubr.msk.f32.mxu0 %vm2539_vm2, %v2540_v8 }
  0xd8   :  { %v2094_v11 = vpop.f32.mrb[0].mxu0 }
  0xd9   :  { %v145_v13 = vpop.f32.mrb[1].mxu0  ;;  %v151_v32 = vadd.f32 %v2094_v11, %v2645_v12 }
  0xda   :  { %v146_v14 = vadd.f32 %v2645_v12, %v145_v13 }
  0xdc   :  { %v2097_v55 = vpop.f32.mrb[2].mxu0 }
  0xdd   :  { %v155_v56 = vpop.f32.mrb[3].mxu0 }
  0xde   :  { %v156_v62 = vadd.f32 %v2645_v12, %v155_v56 }
  0xdf   :  { %v258_v15 = vpop.f32.mrb[0].mxu1 }
  0xe0   :  { %v262_v16 = vadd.f32 %v258_v15, %v146_v14  ;;  %v2114_v17 = vpop.f32.mrb[1].mxu1 }
  0xe1   :  { %v2693_v57 = vpop.f32.mrb[4].mxu0 }
  0xe2   :  { %2410 = vtanh.f32 %v262_v16  ;;  %v1948_v19 = vmul.f32 -1.442695, %v262_v16  ;;  %v2695_v58 = vpop.f32.mrb[5].mxu0 }
  0xe4   :  { %2412 = vpow2.f32 %v1948_v19 }
  0xe5   :  { %v2697_v59 = vpop.f32.mrb[6].mxu0 }
  0xe6   :  { %v2699_v60 = vpop.f32.mrb[7].mxu0 }
  0xec   :  { %v2411_v18 = vpop.eup %2410 }
  0xed   :  { %272 = vrot.lane.b32.xlu0 %v2411_v18, %s2541_s23 }
  0xee   :  { %v2413_v20 = vpop.eup %2412 }
  0xef   :  { %v266_v21 = vadd.f32 1.0, %v2413_v20 }
  0xf1   :  { %2414 = vrcp.f32 %v266_v21  ;;  %v161_v21 = vadd.f32 %v2097_v55, %v2645_v12 }
  0xfb   :  { %v2415_v22 = vpop.eup %2414 }
  0xfc   :  { %v270_v25 = vmul.f32 0.0, %v2415_v22 }
 0x15f   :  { %v273_v23 = vpop.permute.xlu0 %272 }
 0x160   :  { %v275_v24 = vmul.f32 %v2415_v22, %v273_v23 }
 0x162   :  { %277 = vrot.lane.b32.xlu0 %v275_v24, %s2542_s3 }
 0x1d4   :  { %v278_v26 = vpop.permute.xlu0 %277 }
 0x1d5   :  { %v280_v27 = vadd.f32 %v278_v26, %v270_v25 }
 0x1d7   :  { %2416 = vtanh.f32 %v280_v27 }
 0x1e1   :  { %v2417_v28 = vpop.eup %2416 }
 0x1e2   :  { %283 = vrot.lane.b32.xlu1 %v2417_v28, %s2541_s23 }
 0x254   :  { %v284_v29 = vpop.permute.xlu1 %283 }
 0x255   :  { %v286_v30 = vmul.f32 %v2415_v22, %v284_v29 }
 0x257   :  { %288 = vrot.lane.b32.xlu1 %v286_v30, %s2542_s3 }
 0x2c9   :  { %v2652_v31 = vpop.permute.xlu1 %288 }
 0x2ca   :  { %2124 = vmatmul.mubr.msk.f32.vlgmr.msra.gmra.mrb[2].mxu1 %vm188_vm3, %v2652_v31 }
 0x2cb   :  { %2320 = vmatpush3.bf16.msra.mxu1 %v2604_v4  ;;  %2145 = vmatprep.mubr.msk.f32.mxu1 %vm2539_vm2, %v2540_v8 }
 0x2cc   :  { %2321 = vmatprep.subr.bf16.mxu1 %v2538_v0 }
 0x2cf   :  { %2323 = vmatpush3.bf16.msra.mxu1 %v2625_v10 }
 0x2d0   :  { %2330 = vmatprep.subr.bf16.mxu1 %v2538_v0 }
 0x39d   :  { %v358_v33 = vpop.f32.mrb[2].mxu1 }
 0x39e   :  { %v362_v34 = vadd.f32 %v358_v33, %v151_v32  ;;  %v2125_v35 = vpop.f32.mrb[3].mxu1 }
 0x3a0   :  { %2418 = vtanh.f32 %v362_v34  ;;  %v1950_v37 = vmul.f32 -1.442695, %v362_v34 }
 0x3a2   :  { %2420 = vpow2.f32 %v1950_v37 }
 0x3aa   :  { %v2419_v36 = vpop.eup %2418 }
 0x3ab   :  { %372 = vrot.lane.b32.xlu0 %v2419_v36, %s2541_s23 }
 0x3ac   :  { %v2421_v38 = vpop.eup %2420 }
 0x3ad   :  { %v366_v39 = vadd.f32 1.0, %v2421_v38 }
 0x3af   :  { %2422 = vrcp.f32 %v366_v39 }
 0x3b9   :  { %v2423_v40 = vpop.eup %2422 }
 0x3ba   :  { %v370_v43 = vmul.f32 %v2423_v40, %v280_v27 }
 0x41d   :  { %v373_v41 = vpop.permute.xlu0 %372 }
 0x41e   :  { %v375_v42 = vmul.f32 %v2423_v40, %v373_v41 }
 0x420   :  { %377 = vrot.lane.b32.xlu1 %v375_v42, %s2542_s3 }
 0x492   :  { %v378_v44 = vpop.permute.xlu1 %377 }
 0x493   :  { %v380_v45 = vadd.f32 %v378_v44, %v370_v43 }
 0x495   :  { %2424 = vtanh.f32 %v380_v45 }
 0x49f   :  { %v2425_v52 = vpop.eup %2424 }
 0x4a0   :  { %383 = vrot.lane.b32.xlu0 %v2425_v52, %s2541_s23 }
 0x512   :  { %v384_v53 = vpop.permute.xlu0 %383 }
 0x513   :  { %v386_v54 = vmul.f32 %v2423_v40, %v384_v53  ;;  %v166_v40 = vadd.f32 %v2645_v12, %v2695_v58 }
 0x515   :  { %388 = vrot.lane.b32.xlu1 %v386_v54, %s2542_s3 }
 0x587   :  { %v2701_v61 = vpop.permute.xlu1 %388 }
 0x588   :  { %2135 = vmatmul.mubr.msk.f32.vlgmr.msra.gmra.mrb[8].mxu0 %vm188_vm3, %v2701_v61 }
 0x589   :  { %2326 = vmatpush3.bf16.msra.mxu0 %v2604_v4  ;;  %2156 = vmatprep.mubr.msk.f32.mxu0 %vm2539_vm2, %v2540_v8 }
 0x58a   :  { %2327 = vmatprep.subr.bf16.mxu0 %v2538_v0 }
 0x58d   :  { %2329 = vmatpush3.bf16.msra.mxu0 %v2625_v10 }
 0x58e   :  { %2336 = vmatprep.subr.bf16.mxu0 %v2538_v0 }
 0x65b   :  { %v458_v63 = vpop.f32.mrb[8].mxu0 }
 0x65c   :  { %v462_v1 = vadd.f32 %v458_v63, %v156_v62  ;;  %v2136_v2 = vpop.f32.mrb[9].mxu0  ;;  %v171_v62 = vadd.f32 %v2693_v57, %v2645_v12 }
 0x65e   :  { %2426 = vtanh.f32 %v462_v1  ;;  %v1952_v5 = vmul.f32 -1.442695, %v462_v1 }
 0x660   :  { %2428 = vpow2.f32 %v1952_v5 }
 0x668   :  { %v2427_v3 = vpop.eup %2426 }
 0x669   :  { %472 = vrot.lane.b32.xlu0 %v2427_v3, %s2541_s23 }
 0x66a   :  { %v2429_v6 = vpop.eup %2428 }
 0x66b   :  { %v466_v7 = vadd.f32 1.0, %v2429_v6 }
 0x66d   :  { %2430 = vrcp.f32 %v466_v7 }
 0x677   :  { %v2431_v9 = vpop.eup %2430 }
 0x678   :  { %v470_v14 = vmul.f32 %v2431_v9, %v380_v45 }
 0x6db   :  { %v473_v11 = vpop.permute.xlu0 %472 }
 0x6dc   :  { %v475_v13 = vmul.f32 %v2431_v9, %v473_v11 }
 0x6de   :  { %477 = vrot.lane.b32.xlu1 %v475_v13, %s2542_s3 }
 0x750   :  { %v478_v15 = vpop.permute.xlu1 %477 }
 0x751   :  { %v480_v16 = vadd.f32 %v478_v15, %v470_v14  ;;  %v987_v14 = vld [vmem:[%s2952_s4] sm:$0xff]  ;;  %v988_v15 = vld [vmem:[%s2952_s4 + $0x8] sm:$0xff] }
 0x753   :  { %2432 = vtanh.f32 %v480_v16 }
 0x75d   :  { %v2433_v17 = vpop.eup %2432 }
 0x75e   :  { %483 = vrot.lane.b32.xlu0 %v2433_v17, %s2541_s23 }
 0x7d0   :  { %v484_v18 = vpop.permute.xlu0 %483 }
 0x7d1   :  { %v486_v19 = vmul.f32 %v2431_v9, %v484_v18 }
 0x7d3   :  { %488 = vrot.lane.b32.xlu1 %v486_v19, %s2542_s3 }
 0x845   :  { %v2716_v20 = vpop.permute.xlu1 %488 }
 0x846   :  { %2146 = vmatmul.mubr.msk.f32.vlgmr.msra.gmra.mrb[4].mxu1 %vm188_vm3, %v2716_v20 }
 0x847   :  { %2332 = vmatpush3.bf16.msra.mxu1 %v2604_v4  ;;  %2167 = vmatprep.mubr.msk.f32.mxu1 %vm2539_vm2, %v2540_v8 }
 0x848   :  { %2333 = vmatprep.subr.bf16.mxu1 %v2538_v0 }
 0x84b   :  { %2335 = vmatpush3.bf16.msra.mxu1 %v2625_v10 }
 0x84c   :  { %2342 = vmatprep.subr.bf16.mxu1 %v2538_v0 }
 0x919   :  { %v558_v22 = vpop.f32.mrb[4].mxu1 }
 0x91a   :  { %v562_v23 = vadd.f32 %v558_v22, %v161_v21  ;;  %v2147_v24 = vpop.f32.mrb[5].mxu1  ;;  %v989_v21 = vld [vmem:[%s2952_s4 + $0x10] sm:$0xff]  ;;  %v990_v22 = vld [vmem:[%s2952_s4 + $0x18] sm:$0xff] }
 0x91c   :  { %2434 = vtanh.f32 %v562_v23  ;;  %v1954_v26 = vmul.f32 -1.442695, %v562_v23  ;;  %v2352_v23 = vpack.c.bf16 %v990_v22, %v989_v21 }
 0x91e   :  { %2436 = vpow2.f32 %v1954_v26 }
 0x926   :  { %v2435_v25 = vpop.eup %2434 }
 0x927   :  { %572 = vrot.lane.b32.xlu0 %v2435_v25, %s2541_s23 }
 0x928   :  { %v2437_v27 = vpop.eup %2436 }
 0x929   :  { %v566_v28 = vadd.f32 1.0, %v2437_v27 }
 0x92b   :  { %2438 = vrcp.f32 %v566_v28 }
 0x935   :  { %v2439_v29 = vpop.eup %2438 }
 0x936   :  { %v570_v33 = vmul.f32 %v2439_v29, %v480_v16  ;;  %v2348_v16 = vpack.c.bf16 %v988_v15, %v987_v14 }
 0x999   :  { %v573_v30 = vpop.permute.xlu0 %572 }
 0x99a   :  { %v575_v32 = vmul.f32 %v2439_v29, %v573_v30 }
 0x99c   :  { %577 = vrot.lane.b32.xlu1 %v575_v32, %s2542_s3 }
 0xa0e   :  { %v578_v34 = vpop.permute.xlu1 %577 }
 0xa0f   :  { %v580_v35 = vadd.f32 %v578_v34, %v570_v33 }
 0xa11   :  { %2440 = vtanh.f32 %v580_v35 }
 0xa1b   :  { %v2441_v36 = vpop.eup %2440 }
 0xa1c   :  { %583 = vrot.lane.b32.xlu0 %v2441_v36, %s2541_s23 }
 0xa8e   :  { %v584_v37 = vpop.permute.xlu0 %583 }
 0xa8f   :  { %v586_v38 = vmul.f32 %v2439_v29, %v584_v37 }
 0xa91   :  { %588 = vrot.lane.b32.xlu1 %v586_v38, %s2542_s3 }
 0xb03   :  { %v2731_v39 = vpop.permute.xlu1 %588 }
 0xb04   :  { %2157 = vmatmul.mubr.msk.f32.vlgmr.msra.gmra.mrb[10].mxu0 %vm188_vm3, %v2731_v39 }
 0xb05   :  { %2338 = vmatpush3.bf16.msra.mxu0 %v2604_v4  ;;  %2178 = vmatprep.mubr.msk.f32.mxu0 %vm2539_vm2, %v2540_v8 }
 0xb06   :  { %2339 = vmatprep.subr.bf16.mxu0 %v2538_v0 }
 0xb09   :  { %2341 = vmatpush3.bf16.msra.mxu0 %v2625_v10 }
 0xb0a   :  { %2349 = vmatprep.subr.bf16.mxu0 %v2348_v16 }
 0xbd7   :  { %v658_v41 = vpop.f32.mrb[10].mxu0 }
 0xbd8   :  { %v662_v42 = vadd.f32 %v658_v41, %v166_v40  ;;  %v2158_v43 = vpop.f32.mrb[11].mxu0 }
 0xbd9   :  { %v1108_v43 = vld [vmem:[%s2953_s5] sm:$0xff] }
 0xbda   :  { %2442 = vtanh.f32 %v662_v42  ;;  %v1956_v45 = vmul.f32 -1.442695, %v662_v42 }
 0xbdc   :  { %2444 = vpow2.f32 %v1956_v45 }
 0xbe4   :  { %v2443_v44 = vpop.eup %2442 }
 0xbe5   :  { %672 = vrot.lane.b32.xlu0 %v2443_v44, %s2541_s23  ;;  %v1109_v44 = vld [vmem:[%s2953_s5 + $0x8] sm:$0xff] }
 0xbe6   :  { %v2445_v46 = vpop.eup %2444  ;;  %v2807_v45 = vpack.c.bf16 %v1109_v44, %v1108_v43 }
 0xbe7   :  { %v666_v47 = vadd.f32 1.0, %v2445_v46  ;;  %v1110_v46 = vld [vmem:[%s2953_s5 + $0x10] sm:$0xff] }
 0xbe9   :  { %2446 = vrcp.f32 %v666_v47  ;;  %v1111_v47 = vld [vmem:[%s2953_s5 + $0x18] sm:$0xff] }
 0xbf3   :  { %v2447_v48 = vpop.eup %2446 }
 0xbf4   :  { %v670_v51 = vmul.f32 %v2447_v48, %v580_v35 }
 0xc57   :  { %v673_v49 = vpop.permute.xlu0 %672 }
 0xc58   :  { %v675_v50 = vmul.f32 %v2447_v48, %v673_v49 }
 0xc5a   :  { %677 = vrot.lane.b32.xlu1 %v675_v50, %s2542_s3 }
 0xccc   :  { %v678_v52 = vpop.permute.xlu1 %677 }
 0xccd   :  { %v680_v53 = vadd.f32 %v678_v52, %v670_v51  ;;  %v181_v52 = vadd.f32 %v2697_v59, %v2645_v12 }
 0xccf   :  { %2448 = vtanh.f32 %v680_v53 }
 0xcd9   :  { %v2449_v54 = vpop.eup %2448 }
 0xcda   :  { %683 = vrot.lane.b32.xlu0 %v2449_v54, %s2541_s23 }
 0xd4c   :  { %v684_v55 = vpop.permute.xlu0 %683 }
 0xd4d   :  { %v686_v56 = vmul.f32 %v2447_v48, %v684_v55  ;;  %v2817_v48 = vpack.c.bf16 %v1111_v47, %v1110_v46 }
 0xd4f   :  { %688 = vrot.lane.b32.xlu1 %v686_v56, %s2542_s3  ;;  %v2842_v56 = vld [vmem:[%s2954_s6] ss:$0 sm:$0xff] }
 0xdc1   :  { %v689_v58 = vpop.permute.xlu1 %688 }
 0xdc2   :  { %2168 = vmatmul.mubr.msk.f32.vlgmr.msra.gmra.mrb[6].mxu1 %vm188_vm3, %v689_v58 }
 0xdc3   :  { %2344 = vmatpush3.bf16.msra.mxu1 %v2604_v4  ;;  %2189 = vmatprep.mubr.msk.f32.mxu1 %vm2539_vm2, %v2540_v8 }
 0xdc4   :  { %2345 = vmatprep.subr.bf16.mxu1 %v2538_v0 }
 0xdc7   :  { %2347 = vmatpush3.bf16.msra.mxu1 %v2625_v10 }
 0xdc8   :  { %2356 = vmatprep.subr.bf16.mxu1 %v2538_v0 }
 0xe95   :  { %v758_v63 = vpop.f32.mrb[6].mxu1 }
 0xe96   :  { %v762_v1 = vadd.f32 %v758_v63, %v171_v62  ;;  %v2169_v2 = vpop.f32.mrb[7].mxu1 }
 0xe98   :  { %2450 = vtanh.f32 %v762_v1  ;;  %v1958_v4 = vmul.f32 -1.442695, %v762_v1 }
 0xe9a   :  { %2452 = vpow2.f32 %v1958_v4 }
 0xea2   :  { %v2451_v3 = vpop.eup %2450 }
 0xea3   :  { %772 = vrot.lane.b32.xlu0 %v2451_v3, %s2541_s23 }
 0xea4   :  { %v2453_v5 = vpop.eup %2452 }
 0xea5   :  { %v766_v6 = vadd.f32 1.0, %v2453_v5 }
 0xea7   :  { %2454 = vrcp.f32 %v766_v6 }
 0xeb1   :  { %v2455_v7 = vpop.eup %2454 }
 0xeb2   :  { %v770_v11 = vmul.f32 %v2455_v7, %v680_v53 }
 0xf15   :  { %v773_v9 = vpop.permute.xlu0 %772 }
 0xf16   :  { %v775_v10 = vmul.f32 %v2455_v7, %v773_v9 }
 0xf18   :  { %777 = vrot.lane.b32.xlu1 %v775_v10, %s2542_s3 }
 0xf8a   :  { %v778_v13 = vpop.permute.xlu1 %777 }
 0xf8b   :  { %v780_v57 = vadd.f32 %v778_v13, %v770_v11 }
 0xf8d   :  { %2456 = vtanh.f32 %v780_v57 }
 0xf97   :  { %v2457_v17 = vpop.eup %2456 }
 0xf98   :  { %783 = vrot.lane.b32.xlu0 %v2457_v17, %s2541_s23 }
0x100a   :  { %v784_v18 = vpop.permute.xlu0 %783 }
0x100b   :  { %v786_v19 = vmul.f32 %v2455_v7, %v784_v18 }
0x100d   :  { %788 = vrot.lane.b32.xlu1 %v786_v19, %s2542_s3 }
0x107f   :  { %v789_v24 = vpop.permute.xlu1 %788 }
0x1080   :  { %2179 = vmatmul.mubr.msk.f32.vlgmr.msra.gmra.mrb[12].mxu0 %vm188_vm3, %v789_v24 }
0x1081   :  { %2351 = vmatpush3.bf16.msra.mxu0 %v2348_v16  ;;  %2200 = vmatprep.mubr.msk.f32.mxu0 %vm188_vm3, %v2652_v31  ;;  %v176_v31 = vadd.f32 %v2645_v12, %v2699_v60 }
0x1082   :  { %2353 = vmatprep.subr.bf16.mxu0 %v2352_v23 }
0x1085   :  { %2355 = vmatpush3.bf16.msra.mxu0 %v2352_v23 }
0x1086   :  { %2368 = vmatprep.subr.bf16.mxu0 %v2538_v0 }
0x1088   :  { %2201 = vmatmul.mubr.msk.f32.vlgmr.msra.gmra.mrb[14].mxu0 %vm188_vm3, %v2701_v61 }
0x1089   :  { %2203 = vmatprep.mubr.msk.f32.mxu0 %vm188_vm3, %v2716_v20  ;;  %2370 = vmatpush3.bf16.msra.mxu0 %v2807_v45 }
0x108a   :  { %2371 = vmatprep.subr.bf16.mxu0 %v2538_v0 }
0x108c   :  { %2204 = vmatmul.mubr.msk.f32.gmra.mrb[16].mxu0 %vm188_vm3, %v2731_v39 }
0x108d   :  { %2206 = vmatprep.mubr.msk.f32.mxu0 %vm188_vm3, %v689_v58  ;;  %2373 = vmatpush3.bf16.msra.mxu0 %v2817_v48 }
0x108e   :  { %2380 = vmatprep.subr.bf16.mxu0 %v2538_v0 }
0x1090   :  { %2207 = vmatmul.mubr.msk.f32.gmra.mrb[18].mxu0 %vm188_vm3, %v789_v24 }
0x1153   :  { %v858_v25 = vpop.f32.mrb[12].mxu0 }
0x1154   :  { %v862_v26 = vadd.f32 %v858_v25, %v176_v31  ;;  %v2180_v27 = vpop.f32.mrb[13].mxu0 }
0x1156   :  { %2458 = vtanh.f32 %v862_v26  ;;  %v1960_v34 = vmul.f32 -1.442695, %v862_v26 }
0x1158   :  { %2460 = vpow2.f32 %v1960_v34 }
0x115b   :  { %v2785_v28 = vpop.f32.mrb[14].mxu0 }
0x115c   :  { %v1069_v61 = vpop.f32.mrb[15].mxu0 }
0x115d   :  { %v1070_v58 = vadd.f32 %v2842_v56, %v1069_v61  ;;  %v1075_v61 = vadd.f32 %v2785_v28, %v2842_v56 }
0x115f   :  { %v2787_v29 = vpop.f32.mrb[16].mxu0 }
0x1160   :  { %v2459_v20 = vpop.eup %2458  ;;  %v2789_v30 = vpop.f32.mrb[17].mxu0 }
0x1161   :  { %872 = vrot.lane.b32.xlu0 %v2459_v20, %s2541_s23 }
0x1162   :  { %v2461_v60 = vpop.eup %2460 }
0x1163   :  { %v2792_v32 = vpop.f32.mrb[18].mxu0  ;;  %v866_v35 = vadd.f32 1.0, %v2461_v60 }
0x1164   :  { %v2794_v33 = vpop.f32.mrb[19].mxu0 }
0x1165   :  { %2462 = vrcp.f32 %v866_v35 }
0x116f   :  { %v2463_v36 = vpop.eup %2462 }
0x1170   :  { %v870_v39 = vmul.f32 %v2463_v36, %v780_v57 }
0x11d3   :  { %v873_v37 = vpop.permute.xlu0 %872 }
0x11d4   :  { %v875_v38 = vmul.f32 %v2463_v36, %v873_v37 }
0x11d6   :  { %877 = vrot.lane.b32.xlu1 %v875_v38, %s2542_s3 }
0x1248   :  { %v878_v40 = vpop.permute.xlu1 %877 }
0x1249   :  { %v2797_v41 = vadd.f32 %v878_v40, %v870_v39 }
0x124b   :  { %2464 = vtanh.f32 %v2797_v41 }
0x1255   :  { %v2465_v42 = vpop.eup %2464 }
0x1256   :  { %883 = vrot.lane.b32.xlu0 %v2465_v42, %s2541_s23 }
0x12c8   :  { %v884_v49 = vpop.permute.xlu0 %883 }
0x12c9   :  { %v886_v50 = vmul.f32 %v2463_v36, %v884_v49 }
0x12cb   :  { %888 = vrot.lane.b32.xlu1 %v886_v50, %s2542_s3 }
0x133d   :  { %v889_v51 = vpop.permute.xlu1 %888 }
0x133e   :  { %2190 = vmatmul.mubr.msk.f32.vlgmr.msra.gmra.mrb[8].mxu1 %vm188_vm3, %v889_v51  ;;  %2209 = vmatprep.mubr.msk.f32.mxu0 %vm188_vm3, %v889_v51 }
0x133f   :  { %2358 = vmatpush3.bf16.msra.mxu1 %v2807_v45  ;;  %2220 = vmatprep.mubr.msk.f32.mxu1 %vm2539_vm2, %v2540_v8 }
0x1340   :  { %2359 = vmatprep.subr.bf16.mxu1 %v2538_v0 }
0x1343   :  { %2361 = vmatpush3.bf16.msra.mxu1 %v2817_v48 }
0x1344   :  { %2362 = vmatprep.subr.bf16.mxu1 %v2538_v0 }
0x1346   :  { %2221 = vmatmul.mubr.f32.vlgmr.msra.gmra.mrb[10].mxu1 %v2540_v8 }
0x1347   :  { %2364 = vmatpush3.bf16.msra.mxu1 %v2807_v45  ;;  %2231 = vmatprep.mubr.msk.f32.mxu1 %vm2539_vm2, %v2540_v8 }
0x1348   :  { %2365 = vmatprep.subr.bf16.mxu1 %v2538_v0 }
0x134b   :  { %2367 = vmatpush3.bf16.msra.mxu1 %v2817_v48 }
0x134c   :  { %2374 = vmatprep.subr.bf16.mxu1 %v2538_v0 }
0x1411   :  { %v958_v53 = vpop.f32.mrb[8].mxu1 }
0x1412   :  { %v962_v54 = vadd.f32 %v958_v53, %v181_v52  ;;  %v2191_v55 = vpop.f32.mrb[9].mxu1  ;;  %v1080_v53 = vadd.f32 %v2842_v56, %v2789_v30 }
0x1414   :  { %v1962_v57 = vmul.f32 -1.442695, %v962_v54 }
0x1419   :  { %v1178_v62 = vpop.f32.mrb[10].mxu1 }
0x141a   :  { %v1182_v63 = vadd.f32 %v1178_v62, %v1070_v58  ;;  %v2222_v1 = vpop.f32.mrb[11].mxu1 }
0x141c   :  { %2466 = vtanh.f32 %v1182_v63  ;;  %v1972_v3 = vmul.f32 -1.442695, %v1182_v63 }
0x141e   :  { %2468 = vpow2.f32 %v1972_v3 }
0x1426   :  { %v2467_v2 = vpop.eup %2466 }
0x1427   :  { %1192 = vrot.lane.b32.xlu0 %v2467_v2, %s2541_s23 }
0x1428   :  { %v2469_v12 = vpop.eup %2468 }
0x1429   :  { %v1186_v59 = vadd.f32 1.0, %v2469_v12 }
0x142b   :  { %2470 = vrcp.f32 %v1186_v59 }
0x1435   :  { %v2471_v4 = vpop.eup %2470 }
0x1436   :  { %v1190_v7 = vmul.f32 0.0, %v2471_v4 }
0x1499   :  { %v1193_v5 = vpop.permute.xlu0 %1192 }
0x149a   :  { %v1195_v6 = vmul.f32 %v2471_v4, %v1193_v5 }
0x149c   :  { %1197 = vrot.lane.b32.xlu1 %v1195_v6, %s2542_s3 }
0x150e   :  { %v1198_v9 = vpop.permute.xlu1 %1197 }
0x150f   :  { %v1200_v10 = vadd.f32 %v1198_v9, %v1190_v7 }
0x1511   :  { %2472 = vtanh.f32 %v1200_v10 }
0x1512   :  { %2474 = vtanh.f32 %v962_v54 }
0x1513   :  { %2476 = vpow2.f32 %v1962_v57 }
0x151b   :  { %v2473_v11 = vpop.eup %2472 }
0x151c   :  { %1203 = vrot.lane.b32.xlu0 %v2473_v11, %s2541_s23  ;;  %v2475_v13 = vpop.eup %2474  ;;  %v1085_v11 = vadd.f32 %v2787_v29, %v2842_v56 }
0x151d   :  { %v2477_v14 = vpop.eup %2476 }
0x151e   :  { %v966_v15 = vadd.f32 1.0, %v2477_v14 }
0x1520   :  { %972 = vrot.lane.b32.xlu0 %v2475_v13, %s2541_s23  ;;  %2478 = vrcp.f32 %v966_v15 }
0x152a   :  { %v2479_v18 = vpop.eup %2478 }
0x152b   :  { %v970_v23 = vmul.f32 %v2479_v18, %v2797_v41 }
0x158e   :  { %v1204_v16 = vpop.permute.xlu0 %1203 }
0x158f   :  { %v1206_v17 = vmul.f32 %v2471_v4, %v1204_v16 }
0x1591   :  { %1208 = vrot.lane.b32.xlu1 %v1206_v17, %s2542_s3 }
0x1592   :  { %v973_v19 = vpop.permute.xlu0 %972 }
0x1593   :  { %v975_v21 = vmul.f32 %v2479_v18, %v973_v19 }
0x1595   :  { %977 = vrot.lane.b32.xlu0 %v975_v21, %s2542_s3 }
0x1603   :  { %v1209_v22 = vpop.permute.xlu1 %1208 }
0x1604   :  { %2232 = vmatmul.mubr.msk.f32.vlgmr.msra.gmra.mrb[12].mxu1 %vm188_vm3, %v1209_v22 }
0x1605   :  { %2376 = vmatpush3.bf16.msra.mxu1 %v2807_v45  ;;  %2253 = vmatprep.mubr.msk.f32.mxu1 %vm2539_vm2, %v2540_v8 }
0x1606   :  { %2377 = vmatprep.subr.bf16.mxu1 %v2538_v0 }
0x1607   :  { %v978_v24 = vpop.permute.xlu0 %977 }
0x1608   :  { %v980_v31 = vadd.f32 %v978_v24, %v970_v23 }
0x1609   :  { %2379 = vmatpush3.bf16.msra.mxu1 %v2817_v48 }
0x160a   :  { %2480 = vtanh.f32 %v980_v31  ;;  %2386 = vmatprep.subr.bf16.mxu1 %v2538_v0 }
0x1614   :  { %v2481_v25 = vpop.eup %2480 }
0x1615   :  { %983 = vrot.lane.b32.xlu0 %v2481_v25, %s2541_s23 }
0x1687   :  { %v984_v26 = vpop.permute.xlu0 %983 }
0x1688   :  { %v986_v27 = vmul.f32 %v2479_v18, %v984_v26 }
0x168a   :  { %999 = vrot.lane.b32.xlu0 %v986_v27, %s2542_s3 }
0x16d7   :  { %v1278_v20 = vpop.f32.mrb[12].mxu1 }
0x16d8   :  { %v1282_v34 = vadd.f32 %v1278_v20, %v1075_v61  ;;  %v2233_v60 = vpop.f32.mrb[13].mxu1  ;;  %v1090_v61 = vadd.f32 %v2842_v56, %v2794_v33 }
0x16da   :  { %2482 = vtanh.f32 %v1282_v34  ;;  %v1974_v37 = vmul.f32 -1.442695, %v1282_v34 }
0x16dc   :  { %2484 = vpow2.f32 %v1974_v37 }
0x16e4   :  { %v2483_v35 = vpop.eup %2482 }
0x16e5   :  { %1292 = vrot.lane.b32.xlu1 %v2483_v35, %s2541_s23 }
0x16e6   :  { %v2485_v38 = vpop.eup %2484 }
0x16e7   :  { %v1286_v39 = vadd.f32 1.0, %v2485_v38 }
0x16e9   :  { %2486 = vrcp.f32 %v1286_v39 }
0x16f3   :  { %v2487_v40 = vpop.eup %2486 }
0x16f4   :  { %v1290_v42 = vmul.f32 %v2487_v40, %v1200_v10 }
0x16fc   :  { %v1000_v36 = vpop.permute.xlu0 %999 }
0x16fd   :  { %2210 = vmatmul.mubr.msk.f32.gmra.mrb[20].mxu0 %vm188_vm3, %v1000_v36 }
0x16fe   :  { %2242 = vmatprep.mubr.msk.f32.mxu0 %vm2539_vm2, %v2540_v8 }
0x1757   :  { %v1293_v28 = vpop.permute.xlu1 %1292 }
0x1758   :  { %v1295_v41 = vmul.f32 %v2487_v40, %v1293_v28 }
0x175a   :  { %1297 = vrot.lane.b32.xlu1 %v1295_v41, %s2542_s3 }
0x17cc   :  { %v1298_v43 = vpop.permute.xlu1 %1297 }
0x17cd   :  { %v1300_v44 = vadd.f32 %v1298_v43, %v1290_v42 }
0x17cf   :  { %2488 = vtanh.f32 %v1300_v44 }
0x17d0   :  { %v2868_v46 = vpop.f32.mrb[20].mxu0 }
0x17d1   :  { %v2870_v47 = vpop.f32.mrb[21].mxu0 }
0x17d9   :  { %v2489_v49 = vpop.eup %2488 }
0x17da   :  { %1303 = vrot.lane.b32.xlu1 %v2489_v49, %s2541_s23 }
0x184c   :  { %v1304_v50 = vpop.permute.xlu1 %1303 }
0x184d   :  { %v1306_v51 = vmul.f32 %v2487_v40, %v1304_v50 }
0x184f   :  { %1308 = vrot.lane.b32.xlu1 %v1306_v51, %s2542_s3  ;;  %v1095_v51 = vadd.f32 %v2792_v32, %v2842_v56 }
0x18c1   :  { %v1309_v52 = vpop.permute.xlu1 %1308 }
0x18c2   :  { %2243 = vmatmul.mubr.msk.f32.vlgmr.msra.gmra.mrb[22].mxu0 %vm188_vm3, %v1309_v52 }
0x18c3   :  { %2382 = vmatpush3.bf16.msra.mxu0 %v2807_v45  ;;  %2264 = vmatprep.mubr.msk.f32.mxu0 %vm2539_vm2, %v2540_v8 }
0x18c4   :  { %2383 = vmatprep.subr.bf16.mxu0 %v2538_v0 }
0x18c7   :  { %2385 = vmatpush3.bf16.msra.mxu0 %v2817_v48 }
0x18c8   :  { %2392 = vmatprep.subr.bf16.mxu0 %v2538_v0 }
0x1995   :  { %v1378_v54 = vpop.f32.mrb[22].mxu0 }
0x1996   :  { %v1382_v55 = vadd.f32 %v1378_v54, %v1080_v53  ;;  %v2244_v58 = vpop.f32.mrb[23].mxu0 }
0x1998   :  { %2490 = vtanh.f32 %v1382_v55  ;;  %v1976_v63 = vmul.f32 -1.442695, %v1382_v55 }
0x199a   :  { %2492 = vpow2.f32 %v1976_v63 }
0x19a2   :  { %v2491_v62 = vpop.eup %2490 }
0x19a3   :  { %1392 = vrot.lane.b32.xlu0 %v2491_v62, %s2541_s23 }
0x19a4   :  { %v2493_v1 = vpop.eup %2492 }
0x19a5   :  { %v1386_v2 = vadd.f32 1.0, %v2493_v1 }
0x19a7   :  { %2494 = vrcp.f32 %v1386_v2 }
0x19b1   :  { %v2495_v3 = vpop.eup %2494 }
0x19b2   :  { %v1390_v4 = vmul.f32 %v2495_v3, %v1300_v44 }
0x1a15   :  { %v1393_v12 = vpop.permute.xlu0 %1392 }
0x1a16   :  { %v1395_v59 = vmul.f32 %v2495_v3, %v1393_v12 }
0x1a18   :  { %1397 = vrot.lane.b32.xlu1 %v1395_v59, %s2542_s3 }
0x1a8a   :  { %v1398_v5 = vpop.permute.xlu1 %1397 }
0x1a8b   :  { %v1400_v30 = vadd.f32 %v1398_v5, %v1390_v4  ;;  %v1100_v4 = vadd.f32 %v2842_v56, %v2870_v47 }
0x1a8d   :  { %2496 = vtanh.f32 %v1400_v30 }
0x1a97   :  { %v2497_v6 = vpop.eup %2496 }
0x1a98   :  { %1403 = vrot.lane.b32.xlu0 %v2497_v6, %s2541_s23 }
0x1b0a   :  { %v1404_v7 = vpop.permute.xlu0 %1403 }
0x1b0b   :  { %v1406_v9 = vmul.f32 %v2495_v3, %v1404_v7 }
0x1b0d   :  { %1408 = vrot.lane.b32.xlu1 %v1406_v9, %s2542_s3 }
0x1b7f   :  { %v1409_v10 = vpop.permute.xlu1 %1408 }
0x1b80   :  { %2254 = vmatmul.mubr.msk.f32.vlgmr.msra.gmra.mrb[14].mxu1 %vm188_vm3, %v1409_v10 }
0x1b81   :  { %2388 = vmatpush3.bf16.msra.mxu1 %v2807_v45  ;;  %2275 = vmatprep.mubr.msk.f32.mxu1 %vm2539_vm2, %v2540_v8 }
0x1b82   :  { %2389 = vmatprep.subr.bf16.mxu1 %v2538_v0 }
0x1b85   :  { %2391 = vmatpush3.bf16.msra.mxu1 %v2817_v48 }
0x1b86   :  { %2398 = vmatprep.subr.bf16.mxu1 %v2538_v0 }
0x1c53   :  { %v1478_v13 = vpop.f32.mrb[14].mxu1 }
0x1c54   :  { %v1482_v57 = vadd.f32 %v1478_v13, %v1085_v11  ;;  %v2255_v14 = vpop.f32.mrb[15].mxu1 }
0x1c56   :  { %2498 = vtanh.f32 %v1482_v57  ;;  %v1978_v16 = vmul.f32 -1.442695, %v1482_v57 }
0x1c58   :  { %2500 = vpow2.f32 %v1978_v16 }
0x1c60   :  { %v2499_v15 = vpop.eup %2498 }
0x1c61   :  { %1492 = vrot.lane.b32.xlu0 %v2499_v15, %s2541_s23 }
0x1c62   :  { %v2501_v17 = vpop.eup %2500 }
0x1c63   :  { %v1486_v18 = vadd.f32 1.0, %v2501_v17 }
0x1c65   :  { %2502 = vrcp.f32 %v1486_v18 }
0x1c6f   :  { %v2503_v19 = vpop.eup %2502 }
0x1c70   :  { %v1490_v23 = vmul.f32 %v2503_v19, %v1400_v30 }
0x1cd3   :  { %v1493_v21 = vpop.permute.xlu0 %1492 }
0x1cd4   :  { %v1495_v22 = vmul.f32 %v2503_v19, %v1493_v21 }
0x1cd6   :  { %1497 = vrot.lane.b32.xlu1 %v1495_v22, %s2542_s3  ;;  %v1105_v22 = vadd.f32 %v2868_v46, %v2842_v56  ;;  %v1987_v56 = vld [vmem:[%s2955_s7] ss:$0 sm:$0xff] }
0x1d48   :  { %v1498_v24 = vpop.permute.xlu1 %1497 }
0x1d49   :  { %v1500_v29 = vadd.f32 %v1498_v24, %v1490_v23 }
0x1d4b   :  { %2504 = vtanh.f32 %v1500_v29 }
0x1d55   :  { %v2505_v31 = vpop.eup %2504 }
0x1d56   :  { %1503 = vrot.lane.b32.xlu0 %v2505_v31, %s2541_s23 }
0x1dc8   :  { %v1504_v25 = vpop.permute.xlu0 %1503 }
0x1dc9   :  { %v1506_v26 = vmul.f32 %v2503_v19, %v1504_v25 }
0x1dcb   :  { %1508 = vrot.lane.b32.xlu1 %v1506_v26, %s2542_s3 }
0x1e3d   :  { %v1509_v27 = vpop.permute.xlu1 %1508 }
0x1e3e   :  { %2265 = vmatmul.mubr.msk.f32.vlgmr.msra.gmra.mrb[24].mxu0 %vm188_vm3, %v1509_v27 }
0x1e3f   :  { %2394 = vmatpush3.bf16.msra.mxu0 %v2807_v45  ;;  %2286 = vmatprep.mubr.msk.f32.mxu0 %vm2539_vm2, %v2540_v8 }
0x1e40   :  { %2395 = vmatprep.subr.bf16.mxu0 %v2538_v0 }
0x1e43   :  { %2397 = vmatpush3.bf16.msra.mxu0 %v2817_v48 }
0x1f11   :  { %v1578_v20 = vpop.f32.mrb[24].mxu0 }
0x1f12   :  { %v1582_v34 = vadd.f32 %v1578_v20, %v1090_v61  ;;  %v2266_v60 = vpop.f32.mrb[25].mxu0 }
0x1f14   :  { %2506 = vtanh.f32 %v1582_v34  ;;  %v1980_v36 = vmul.f32 -1.442695, %v1582_v34 }
0x1f16   :  { %2508 = vpow2.f32 %v1980_v36 }
0x1f1e   :  { %v2507_v35 = vpop.eup %2506 }
0x1f1f   :  { %1592 = vrot.lane.b32.xlu0 %v2507_v35, %s2541_s23 }
0x1f20   :  { %v2509_v37 = vpop.eup %2508 }
0x1f21   :  { %v1586_v38 = vadd.f32 1.0, %v2509_v37  ;;  %v14_v37 = vstv %s2956_s8 }
0x1f22   :  { %15 = vst [vmem:[#allocation2] sm:$0x1] %v14_v37 }
0x1f23   :  { %2510 = vrcp.f32 %v1586_v38 }
0x1f2d   :  { %v2511_v39 = vpop.eup %2510 }
0x1f2e   :  { %v1590_v41 = vmul.f32 %v2511_v39, %v1500_v29 }
0x1f91   :  { %v1593_v40 = vpop.permute.xlu0 %1592 }
0x1f92   :  { %v1595_v28 = vmul.f32 %v2511_v39, %v1593_v40 }
0x1f94   :  { %1597 = vrot.lane.b32.xlu1 %v1595_v28, %s2542_s3 }
0x2006   :  { %v1598_v42 = vpop.permute.xlu1 %1597 }
0x2007   :  { %v1600_v33 = vadd.f32 %v1598_v42, %v1590_v41 }
0x2009   :  { %2512 = vtanh.f32 %v1600_v33 }
0x2013   :  { %v2513_v43 = vpop.eup %2512 }
0x2014   :  { %1603 = vrot.lane.b32.xlu0 %v2513_v43, %s2541_s23 }
0x2086   :  { %v1604_v44 = vpop.permute.xlu0 %1603 }
0x2087   :  { %v1606_v49 = vmul.f32 %v2511_v39, %v1604_v44 }
0x2089   :  { %1608 = vrot.lane.b32.xlu1 %v1606_v49, %s2542_s3 }
0x20fb   :  { %v1609_v50 = vpop.permute.xlu1 %1608 }
0x20fc   :  { %2276 = vmatmul.mubr.msk.f32.vlgmr.msra.gmra.mrb[16].mxu1 %vm188_vm3, %v1609_v50 }
0x20fd   :  { %2400 = vmatpush3.bf16.msra.mxu1 %v2807_v45  ;;  %2297 = vmatprep.mubr.msk.f32.mxu1 %vm2539_vm2, %v2540_v8 }
0x20fe   :  { %2401 = vmatprep.subr.bf16.mxu1 %v2538_v0 }
0x2101   :  { %2403 = vmatpush3.bf16.msra.mxu1 %v2817_v48 }
0x21cf   :  { %v1678_v52 = vpop.f32.mrb[16].mxu1 }
0x21d0   :  { %v1682_v53 = vadd.f32 %v1678_v52, %v1095_v51  ;;  %v2277_v54 = vpop.f32.mrb[17].mxu1 }
0x21d2   :  { %2514 = vtanh.f32 %v1682_v53  ;;  %v1982_v58 = vmul.f32 -1.442695, %v1682_v53 }
0x21d4   :  { %2516 = vpow2.f32 %v1982_v58 }
0x21dc   :  { %v2515_v55 = vpop.eup %2514 }
0x21dd   :  { %1692 = vrot.lane.b32.xlu0 %v2515_v55, %s2541_s23 }
0x21de   :  { %v2517_v45 = vpop.eup %2516 }
0x21df   :  { %v1686_v62 = vadd.f32 1.0, %v2517_v45 }
0x21e1   :  { %2518 = vrcp.f32 %v1686_v62 }
0x21eb   :  { %v2519_v8 = vpop.eup %2518 }
0x21ec   :  { %v1690_v48 = vmul.f32 %v2519_v8, %v1600_v33  ;;  %v1988_v33 = vld [vmem:[#allocation2] ss:$0 sm:$0xff] }
0x224f   :  { %v1693_v63 = vpop.permute.xlu0 %1692 }
0x2250   :  { %v1695_v0 = vmul.f32 %v2519_v8, %v1693_v63 }
0x2252   :  { %1697 = vrot.lane.b32.xlu1 %v1695_v0, %s2542_s3 }
0x22c4   :  { %v1698_v1 = vpop.permute.xlu1 %1697 }
0x22c5   :  { %v1700_v32 = vadd.f32 %v1698_v1, %v1690_v48 }
0x22c7   :  { %2520 = vtanh.f32 %v1700_v32 }
0x22d1   :  { %v2521_v2 = vpop.eup %2520 }
0x22d2   :  { %1703 = vrot.lane.b32.xlu0 %v2521_v2, %s2541_s23 }
0x2344   :  { %v1704_v3 = vpop.permute.xlu0 %1703 }
0x2345   :  { %v1706_v12 = vmul.f32 %v2519_v8, %v1704_v3 }
0x2347   :  { %1708 = vrot.lane.b32.xlu1 %v1706_v12, %s2542_s3 }
0x23b9   :  { %v1709_v59 = vpop.permute.xlu1 %1708 }
0x23ba   :  { %2287 = vmatmul.mubr.msk.f32.vlgmr.msra.gmra.mrb[26].mxu0 %vm188_vm3, %v1709_v59 }
0x248d   :  { %v1778_v5 = vpop.f32.mrb[26].mxu0 }
0x248e   :  { %v1782_v30 = vadd.f32 %v1778_v5, %v1100_v4  ;;  %v2288_v6 = vpop.f32.mrb[27].mxu0 }
0x2490   :  { %2522 = vtanh.f32 %v1782_v30  ;;  %v1984_v9 = vmul.f32 -1.442695, %v1782_v30 }
0x2492   :  { %2524 = vpow2.f32 %v1984_v9 }
0x249a   :  { %v2523_v7 = vpop.eup %2522 }
0x249b   :  { %1792 = vrot.lane.b32.xlu0 %v2523_v7, %s2541_s23 }
0x249c   :  { %v2525_v10 = vpop.eup %2524 }
0x249d   :  { %v1786_v11 = vadd.f32 1.0, %v2525_v10 }
0x249f   :  { %2526 = vrcp.f32 %v1786_v11 }
0x24a9   :  { %v2527_v13 = vpop.eup %2526 }
0x24aa   :  { %v1790_v15 = vmul.f32 %v2527_v13, %v1700_v32 }
0x250d   :  { %v1793_v57 = vpop.permute.xlu0 %1792 }
0x250e   :  { %v1795_v14 = vmul.f32 %v2527_v13, %v1793_v57 }
0x2510   :  { %1797 = vrot.lane.b32.xlu1 %v1795_v14, %s2542_s3 }
0x2582   :  { %v1798_v16 = vpop.permute.xlu1 %1797 }
0x2583   :  { %v1800_v47 = vadd.f32 %v1798_v16, %v1790_v15 }
0x2585   :  { %2528 = vtanh.f32 %v1800_v47 }
0x258f   :  { %v2529_v17 = vpop.eup %2528 }
0x2590   :  { %1803 = vrot.lane.b32.xlu0 %v2529_v17, %s2541_s23 }
0x2602   :  { %v1804_v18 = vpop.permute.xlu0 %1803 }
0x2603   :  { %v1806_v19 = vmul.f32 %v2527_v13, %v1804_v18 }
0x2605   :  { %1808 = vrot.lane.b32.xlu1 %v1806_v19, %s2542_s3 }
0x2677   :  { %v1809_v21 = vpop.permute.xlu1 %1808 }
0x2678   :  { %2298 = vmatmul.mubr.msk.f32.vlgmr.msra.gmra.mrb[18].mxu1 %vm188_vm3, %v1809_v21 }
0x274b   :  { %v1878_v23 = vpop.f32.mrb[18].mxu1 }
0x274c   :  { %v1882_v24 = vadd.f32 %v1878_v23, %v1105_v22  ;;  %v2299_v29 = vpop.f32.mrb[19].mxu1 }
0x274e   :  { %2530 = vtanh.f32 %v1882_v24  ;;  %v1986_v25 = vmul.f32 -1.442695, %v1882_v24 }
0x2750   :  { %2532 = vpow2.f32 %v1986_v25 }
0x2758   :  { %v2531_v31 = vpop.eup %2530 }
0x2759   :  { %1892 = vrot.lane.b32.xlu0 %v2531_v31, %s2541_s23 }
0x275a   :  { %v2533_v26 = vpop.eup %2532 }
0x275b   :  { %v1886_v27 = vadd.f32 1.0, %v2533_v26 }
0x275d   :  { %2534 = vrcp.f32 %v1886_v27 }
0x2767   :  { %v2535_v61 = vpop.eup %2534 }
0x2768   :  { %v1890_v46 = vmul.f32 %v2535_v61, %v1800_v47 }
0x27cb   :  { %v1893_v20 = vpop.permute.xlu0 %1892 }
0x27cc   :  { %v1895_v34 = vmul.f32 %v2535_v61, %v1893_v20 }
0x27ce   :  { %1897 = vrot.lane.b32.xlu1 %v1895_v34, %s2542_s3 }
0x27d2   :  { %1913 = vrot.lane.b32.xlu1 %v1987_v56, %s2543_s30 }
0x2840   :  { %v1898_v60 = vpop.permute.xlu1 %1897 }
0x2841   :  { %v1900_v35 = vadd.f32 %v1898_v60, %v1890_v46 }
0x2843   :  { %2536 = vtanh.f32 %v1900_v35 }
0x2844   :  { %v1914_v39 = vpop.permute.xlu1 %1913 }
0x284d   :  { %v2537_v36 = vpop.eup %2536 }
0x284e   :  { %1903 = vrot.lane.b32.xlu0 %v2537_v36, %s2541_s23 }
0x28c0   :  { %v1904_v38 = vpop.permute.xlu0 %1903 }
0x28c1   :  { %v1906_v40 = vmul.f32 %v2535_v61, %v1904_v38 }
0x28c3   :  { %v1916_v28 = vmul.f32 %v1914_v39, %v1906_v40 }
0x28c5   :  { %1918 = vrot.lane.b32.xlu0 %v1916_v28, %s2542_s3 }
0x2937   :  { %v1919_v41 = vpop.permute.xlu0 %1918 }
0x2938   :  { %v1921_v42 = vsel %vm188_vm3, %v1919_v41, 0.0 }
0x2939   :  { %1922 = vadd.xlane.f32.xlu1 %v1921_v42 }
0x29c6   :  { %v1923_v43 = vpop.xlane.xlu1 %1922 }
0x29c7   :  { %v1931_v44 = vadd.f32 %v1988_v33, %v1923_v43 }
0x29c9   :  { %1933 = vst.msk [vmem:[%s2957_s9] sm:$0xff] %vm1932_vm4, %v1931_v44 }

</bundles_post_ra>
